<compile_context>
chip_gen: v6e
topology: v6e:2x2x1
jax: 0.10.0
libtpu: 0.0.40
codegen_flags: <defaults>
</compile_context>

<pallas_src>
import math
import functools

import jax
import jax.numpy as jnp
from jax import lax
from jax.experimental import pallas as pl
from jax.experimental.pallas import tpu as pltpu

# Full-f32 matmuls everywhere (kernel + reference). The TPU default (bf16 passes)
# caused most of the previous kernel/reference mismatch.
jax.config.update("jax_default_matmul_precision", "highest")

# ---------------- model hyper-params (small, consistent with the module) -------------
B = 2            # batch
S = 8            # sequence length
E = 32           # embed_dim
NUM_HEADS = 4
HEAD_DIM = E // NUM_HEADS
ENT_RANGE = None # module default; float band mask (additive) supported if set
LN_EPS = 1e-5
_NEG_BIG = -1e30 # cross-batch score mask (exp underflows to exactly 0 in f32)


# ------------------------------------ kernel ----------------------------------------
def _self_attn_kernel(x_ref, w_in_ref, w_out_ref, params_ref, mask_ref, o_ref,
                      *, num_heads):
    """Token-major I/O, feature-major math (keeps PyTorch weight layouts untransposed).

    x_ref      : (B*S, E)    token-major input (tokens packed batch-major)
    w_in_ref   : (3E, E)     PyTorch in_proj_weight, used as-is
    w_out_ref  : (E, E)      PyTorch out_proj.weight, used as-is
    params_ref : (6E, 1)     packed column: [b_in (3E); b_out (E); gamma (E); beta (E)]
    mask_ref   : (B*S, B*S)  precomputed additive scores mask, indexed [key, query]
    o_ref      : (B*S, E)    LayerNorm(x + attn), token-major
    """
    f32 = jnp.float32
    BS, Ef = x_ref.shape
    H = num_heads
    D = Ef // H

    x_tok = x_ref[...].astype(f32)                                       # (BS, E)
    x_t = x_tok.T                                                        # (E, BS) one XLU transpose

    params = params_ref[...].astype(f32)                                 # (6E, 1)
    b_in = params[0:3 * Ef]                                              # (3E, 1)
    b_out = params[3 * Ef:4 * Ef]                                        # (E, 1)
    gamma = params[4 * Ef:5 * Ef]                                        # (E, 1)
    beta = params[5 * Ef:6 * Ef]                                         # (E, 1)

    # ---- QKV projection: ONE (3E,E)@(E,BS) MXU matmul, no weight transpose ----
    # TODO(synk): cast operands to bf16 (keep f32 accumulation) once B*S / E grow.
    qkv_t = jnp.dot(w_in_ref[...].astype(f32), x_t,
                    preferred_element_type=f32) + b_in                   # (3E, BS)

    q_t = qkv_t[0 * Ef:1 * Ef]                                           # sublane slices
    k_t = qkv_t[1 * Ef:2 * Ef]
    v_t = qkv_t[2 * Ef:3 * Ef]

    # ---- head split: free reshapes (sublane dim splits on the native 8-row boundary)
    scale = 1.0 / math.sqrt(D)
    q_h = (q_t * scale).reshape(H, D, BS)                                # (H, D, BS)
    k_h = k_t.reshape(H, D, BS)
    v_h = v_t.reshape(H, D, BS)
    k_hT = jnp.swapaxes(k_h, 1, 2)                                       # (H, BS, D)

    # ---- scores for ALL (batch, head) pairs in one batched dot_general ----
    # scores[h, key, query] = sum_d k[h, key, d] * q_scaled[h, d, query]
    scores = lax.dot_general(k_hT, q_h,
                             dimension_numbers=(((2,), (1,)), ((0,), (0,))),
                             preferred_element_type=f32)                 # (H, BS, BS)

    # ---- precomputed additive mask (block-diagonal batch + optional ent_range band)
    scores = scores + mask_ref[...].astype(f32)[None, :, :]

    # ---- softmax over keys (axis 1), exact divide (approx vrcp costs ~1e-3 rel err)
    m = jnp.max(scores, axis=1, keepdims=True)                           # (H, 1, BS)
    p = jnp.exp(scores - m)
    p = p / jnp.sum(p, axis=1, keepdims=True)

    # ---- context for all heads in one batched dot_general ----
    # ctx[h, d, query] = sum_key v[h, d, key] * p[h, key, query]
    ctx = lax.dot_general(v_h, p,
                          dimension_numbers=(((2,), (1,)), ((0,), (0,))),
                          preferred_element_type=f32)                    # (H, D, BS)
    ctx_t = ctx.reshape(Ef, BS)                                          # free merge -> (E, BS)

    # ---- output projection (no weight transpose) + residual + LayerNorm ----
    out_t = jnp.dot(w_out_ref[...].astype(f32), ctx_t,
                    preferred_element_type=f32) + b_out                  # (E, BS)
    y = x_t + out_t
    mean = jnp.mean(y, axis=0, keepdims=True)                            # (1, BS)
    var = jnp.mean(jnp.square(y - mean), axis=0, keepdims=True)
    y_norm = (y - mean) * lax.rsqrt(var + LN_EPS) * gamma + beta         # (E, BS)

    # Store token-major: lane width 32 (vs 16 before); wrapper reshape is free.
    o_ref[...] = y_norm.T.astype(o_ref.dtype)


# ----------------------------------- wrapper -----------------------------------------
def self_attention(x, w_in, b_in, w_out, b_out, gamma, beta,
                   ent_range=ENT_RANGE, num_heads=NUM_HEADS):
    """x: (B, S, E). Parameters in PyTorch layouts:
       w_in (3E, E), b_in (3E,), w_out (E, E), b_out (E,), gamma (E,), beta (E,)."""
    Bx, Sx, Ex = x.shape
    BS = Bx * Sx

    x_tok = x.reshape(BS, Ex).astype(jnp.float32)        # free reshape, NO transpose

    # One packed parameter column -> a single DMA instead of four tiny ones.
    params = jnp.concatenate([b_in, b_out, gamma, beta], axis=0).astype(jnp.float32)
    params = params.reshape(6 * Ex, 1)

    # Additive scores mask, built once per call OUTSIDE the kernel:
    #  (a) block-diagonal: a query attends only to keys of its own batch element;
    #  (b) optional ent_range band: PyTorch builds a FLOAT mask (+1.0 in-band, +0.0
    #      outside) that is ADDED to the scores -- replicated literally.
    #      TODO(synk): this matches the module; it is not a hard locality mask.
    idx = jnp.arange(BS)
    same_batch = (idx[:, None] // Sx) == (idx[None, :] // Sx)
    if ent_range is not None:
        band = (jnp.abs(idx[:, None] - idx[None, :]) <= ent_range).astype(jnp.float32)
    else:
        band = jnp.zeros((BS, BS), jnp.float32)
    mask = jnp.where(same_batch, band, jnp.float32(_NEG_BIG))            # (BS, BS)

    kernel = functools.partial(_self_attn_kernel, num_heads=num_heads)
    vmem = pl.BlockSpec(memory_space=pltpu.MemorySpace.VMEM)

    # Single invocation (no grid): no per-step overhead, weights staged into VMEM once.
    # TODO(synk): at scale, add a batch/q-tile grid axis with a "parallel"
    #   dimension_semantics entry (so v7x's 2 TensorCores split it), a KV-tiled
    #   flash-style inner loop sized for the per-generation scoped-VMEM default
    #   (16/32/32 MiB on v5e/v6e/v7x, set pltpu.CompilerParams(vmem_limit_bytes=...)
    #   explicitly), and bf16 MXU operands with 128/256-wide token tiles.
    out_tok = pl.pallas_call(
        kernel,
        out_shape=jax.ShapeDtypeStruct((BS, Ex), jnp.float32),
        in_specs=[vmem] * 5,
        out_specs=vmem,
    )(x_tok, w_in, w_out, params, mask)

    return out_tok.reshape(Bx, Sx, Ex).astype(x.dtype)   # free reshape, NO transpose


# ------------------------------ pure-JAX reference -----------------------------------
def self_attention_ref(x, w_in, b_in, w_out, b_out, gamma, beta,
                       ent_range=ENT_RANGE, num_heads=NUM_HEADS):
    Bx, Sx, Ex = x.shape
    H, D = num_heads, Ex // num_heads
    qkv = jnp.einsum("bse,fe->bsf", x, w_in) + b_in                      # (B, S, 3E)
    q, k, v = qkv[..., :Ex], qkv[..., Ex:2 * Ex], qkv[..., 2 * Ex:]

    def split(t):  # (B, S, E) -> (B, H, S, D)
        return t.reshape(Bx, Sx, H, D).transpose(0, 2, 1, 3)

    qh, kh, vh = split(q), split(k), split(v)
    s = jnp.einsum("bhqd,bhkd->bhqk", qh, kh) / math.sqrt(D)
    if ent_range is not None:
        rows = jnp.arange(Sx)[:, None]
        cols = jnp.arange(Sx)[None, :]
        s = s + (jnp.abs(rows - cols) <= ent_range).astype(x.dtype)
    p = jax.nn.softmax(s, axis=-1)
    o = jnp.einsum("bhqk,bhkd->bhqd", p, vh).transpose(0, 2, 1, 3).reshape(Bx, Sx, Ex)
    o = jnp.einsum("bse,fe->bsf", o, w_out) + b_out
    y = x + o
    mean = jnp.mean(y, -1, keepdims=True)
    var = jnp.mean(jnp.square(y - mean), -1, keepdims=True)
    return (y - mean) * jax.lax.rsqrt(var + LN_EPS) * gamma + beta


# ------------------------------------- main -------------------------------------------
if __name__ == "__main__":
    key = jax.random.PRNGKey(0)
    kx, kw_in, kw_out, kb_in, kb_out = jax.random.split(key, 5)

    x = jax.random.normal(kx, (B, S, E), dtype=jnp.float32)

    # parameters in PyTorch-native shapes (nn.MultiheadAttention / nn.LayerNorm)
    w_in = jax.random.normal(kw_in, (3 * E, E), dtype=jnp.float32) * (1.0 / math.sqrt(E))
    b_in = jax.random.normal(kb_in, (3 * E,), dtype=jnp.float32) * 0.02
    w_out = jax.random.normal(kw_out, (E, E), dtype=jnp.float32) * (1.0 / math.sqrt(E))
    b_out = jax.random.normal(kb_out, (E,), dtype=jnp.float32) * 0.02
    gamma = jnp.ones((E,), dtype=jnp.float32)
    beta = jnp.zeros((E,), dtype=jnp.float32)

    # jit the wrapper so the reshape / param-pack / mask build fuse into one program
    # (no extra host-side dispatches around the single-digit-us kernel).
    attn = jax.jit(self_attention)
    out = jax.block_until_ready(attn(x, w_in, b_in, w_out, b_out, gamma, beta))
    ref = self_attention_ref(x, w_in, b_in, w_out, b_out, gamma, beta)

    assert out.shape == (B, S, E)
    max_err = jnp.max(jnp.abs(out - ref))
    # Exact softmax + "highest" matmul precision on both sides: expected error ~1e-5;
    # 2e-3 leaves >100x margin while still catching any real structural bug.
    assert jnp.allclose(out, ref, rtol=2e-3, atol=2e-3), \
        f"mismatch vs pure-JAX reference (max abs err = {max_err})"

    print("KERNEL_OK")
</pallas_src>

<mosaic_0001>
module attributes {stable_mosaic.version = 11 : i64} {
  func.func @_self_attn_kernel(%arg0: memref<16x32xf32, #tpu.memory_space<vmem>>, %arg1: memref<96x32xf32, #tpu.memory_space<vmem>>, %arg2: memref<32x32xf32, #tpu.memory_space<vmem>>, %arg3: memref<192x1xf32, #tpu.memory_space<vmem>>, %arg4: memref<16x16xf32, #tpu.memory_space<vmem>>, %arg5: memref<16x32xf32, #tpu.memory_space<vmem>>) attributes {dimension_semantics = [], scalar_prefetch = 0 : i64, scratch_operands = 0 : i64, tpu.core_type = #tpu.core_type<tc>} {
    %c0 = arith.constant 0 : index
    %c0_0 = arith.constant 0 : index
    %0 = vector.load %arg0[%c0, %c0_0] : memref<16x32xf32, #tpu.memory_space<vmem>>, vector<16x32xf32>
    %1 = tpu.transpose %0, [1, 0] : vector<16x32xf32> -> vector<32x16xf32>
    %c0_1 = arith.constant 0 : index
    %c0_2 = arith.constant 0 : index
    %2 = vector.load %arg3[%c0_1, %c0_2] : memref<192x1xf32, #tpu.memory_space<vmem>>, vector<192x1xf32>
    %3 = vector.extract_strided_slice %2 {offsets = [0, 0], sizes = [96, 1], strides = [1, 1]} : vector<192x1xf32> to vector<96x1xf32>
    %4 = vector.extract_strided_slice %2 {offsets = [96, 0], sizes = [32, 1], strides = [1, 1]} : vector<192x1xf32> to vector<32x1xf32>
    %5 = vector.extract_strided_slice %2 {offsets = [128, 0], sizes = [32, 1], strides = [1, 1]} : vector<192x1xf32> to vector<32x1xf32>
    %6 = vector.extract_strided_slice %2 {offsets = [160, 0], sizes = [32, 1], strides = [1, 1]} : vector<192x1xf32> to vector<32x1xf32>
    %c0_3 = arith.constant 0 : index
    %c0_4 = arith.constant 0 : index
    %7 = vector.load %arg1[%c0_3, %c0_4] : memref<96x32xf32, #tpu.memory_space<vmem>>, vector<96x32xf32>
    %cst = arith.constant dense<0.000000e+00> : vector<96x16xf32>
    %8 = tpu.matmul %7, %1, %cst {dimension_numbers = #tpu.dot_dimension_numbers<[1], [0], [0], [1], [0, 0, 1, 1], [], []>, precision = #tpu.contract_precision<fp32>} : vector<96x32xf32>, vector<32x16xf32>, vector<96x16xf32> -> vector<96x16xf32>
    %9 = vector.broadcast %3 : vector<96x1xf32> to vector<96x16xf32>
    %10 = arith.addf %8, %9 : vector<96x16xf32>
    %11 = vector.extract_strided_slice %10 {offsets = [0, 0], sizes = [32, 16], strides = [1, 1]} : vector<96x16xf32> to vector<32x16xf32>
    %12 = vector.extract_strided_slice %10 {offsets = [32, 0], sizes = [32, 16], strides = [1, 1]} : vector<96x16xf32> to vector<32x16xf32>
    %13 = vector.extract_strided_slice %10 {offsets = [64, 0], sizes = [32, 16], strides = [1, 1]} : vector<96x16xf32> to vector<32x16xf32>
    %cst_5 = arith.constant 0.353553385 : f32
    %14 = vector.broadcast %cst_5 : f32 to vector<32x16xf32>
    %15 = arith.mulf %11, %14 : vector<32x16xf32>
    %16 = vector.shape_cast %15 : vector<32x16xf32> to vector<4x8x16xf32>
    %17 = vector.shape_cast %12 : vector<32x16xf32> to vector<4x8x16xf32>
    %18 = vector.shape_cast %13 : vector<32x16xf32> to vector<4x8x16xf32>
    %19 = tpu.transpose %17, [0, 2, 1] : vector<4x8x16xf32> -> vector<4x16x8xf32>
    %cst_6 = arith.constant dense<0.000000e+00> : vector<4x16x16xf32>
    %20 = tpu.matmul %19, %16, %cst_6 {dimension_numbers = #tpu.dot_dimension_numbers<[2], [1], [1], [2], [0, 0, 0, 1, 1, 2], [0], [0]>, precision = #tpu.contract_precision<fp32>} : vector<4x16x8xf32>, vector<4x8x16xf32>, vector<4x16x16xf32> -> vector<4x16x16xf32>
    %c0_7 = arith.constant 0 : index
    %c0_8 = arith.constant 0 : index
    %21 = vector.load %arg4[%c0_7, %c0_8] : memref<16x16xf32, #tpu.memory_space<vmem>>, vector<16x16xf32>
    %22 = vector.shape_cast %21 : vector<16x16xf32> to vector<1x16x16xf32>
    %23 = vector.broadcast %22 : vector<1x16x16xf32> to vector<4x16x16xf32>
    %24 = arith.addf %20, %23 : vector<4x16x16xf32>
    %cst_9 = arith.constant dense<0xFF800000> : vector<4x16xf32>
    %25 = vector.multi_reduction <maximumf>, %24, %cst_9 [1] : vector<4x16x16xf32> to vector<4x16xf32>
    %26 = vector.shape_cast %25 : vector<4x16xf32> to vector<4x1x16xf32>
    %27 = vector.broadcast %26 : vector<4x1x16xf32> to vector<4x16x16xf32>
    %28 = arith.subf %24, %27 : vector<4x16x16xf32>
    %29 = math.exp %28 : vector<4x16x16xf32>
    %cst_10 = arith.constant dense<0.000000e+00> : vector<4x16xf32>
    %30 = vector.multi_reduction <add>, %29, %cst_10 [1] : vector<4x16x16xf32> to vector<4x16xf32>
    %31 = vector.shape_cast %30 : vector<4x16xf32> to vector<4x1x16xf32>
    %32 = vector.broadcast %31 : vector<4x1x16xf32> to vector<4x16x16xf32>
    %33 = arith.divf %29, %32 : vector<4x16x16xf32>
    %cst_11 = arith.constant dense<0.000000e+00> : vector<4x8x16xf32>
    %34 = tpu.matmul %18, %33, %cst_11 {dimension_numbers = #tpu.dot_dimension_numbers<[2], [1], [1], [2], [0, 0, 0, 1, 1, 2], [0], [0]>, precision = #tpu.contract_precision<fp32>} : vector<4x8x16xf32>, vector<4x16x16xf32>, vector<4x8x16xf32> -> vector<4x8x16xf32>
    %35 = vector.shape_cast %34 : vector<4x8x16xf32> to vector<32x16xf32>
    %c0_12 = arith.constant 0 : index
    %c0_13 = arith.constant 0 : index
    %36 = vector.load %arg2[%c0_12, %c0_13] : memref<32x32xf32, #tpu.memory_space<vmem>>, vector<32x32xf32>
    %cst_14 = arith.constant dense<0.000000e+00> : vector<32x16xf32>
    %37 = tpu.matmul %36, %35, %cst_14 {dimension_numbers = #tpu.dot_dimension_numbers<[1], [0], [0], [1], [0, 0, 1, 1], [], []>, precision = #tpu.contract_precision<fp32>} : vector<32x32xf32>, vector<32x16xf32>, vector<32x16xf32> -> vector<32x16xf32>
    %38 = vector.broadcast %4 : vector<32x1xf32> to vector<32x16xf32>
    %39 = arith.addf %37, %38 : vector<32x16xf32>
    %40 = arith.addf %1, %39 : vector<32x16xf32>
    %cst_15 = arith.constant dense<0.000000e+00> : vector<16xf32>
    %41 = vector.multi_reduction <add>, %40, %cst_15 [0] : vector<32x16xf32> to vector<16xf32>
    %42 = vector.shape_cast %41 : vector<16xf32> to vector<1x16xf32>
    %cst_16 = arith.constant 3.200000e+01 : f32
    %43 = vector.broadcast %cst_16 : f32 to vector<1x16xf32>
    %44 = arith.divf %42, %43 : vector<1x16xf32>
    %45 = vector.broadcast %44 : vector<1x16xf32> to vector<32x16xf32>
    %46 = arith.subf %40, %45 : vector<32x16xf32>
    %47 = arith.mulf %46, %46 : vector<32x16xf32>
    %cst_17 = arith.constant dense<0.000000e+00> : vector<16xf32>
    %48 = vector.multi_reduction <add>, %47, %cst_17 [0] : vector<32x16xf32> to vector<16xf32>
    %49 = vector.shape_cast %48 : vector<16xf32> to vector<1x16xf32>
    %cst_18 = arith.constant 3.200000e+01 : f32
    %50 = vector.broadcast %cst_18 : f32 to vector<1x16xf32>
    %51 = arith.divf %49, %50 : vector<1x16xf32>
    %52 = vector.broadcast %44 : vector<1x16xf32> to vector<32x16xf32>
    %53 = arith.subf %40, %52 : vector<32x16xf32>
    %cst_19 = arith.constant 9.99999974E-6 : f32
    %54 = vector.broadcast %cst_19 : f32 to vector<1x16xf32>
    %55 = arith.addf %51, %54 : vector<1x16xf32>
    %56 = math.rsqrt %55 : vector<1x16xf32>
    %57 = vector.broadcast %56 : vector<1x16xf32> to vector<32x16xf32>
    %58 = arith.mulf %53, %57 : vector<32x16xf32>
    %59 = vector.broadcast %5 : vector<32x1xf32> to vector<32x16xf32>
    %60 = arith.mulf %58, %59 : vector<32x16xf32>
    %61 = vector.broadcast %6 : vector<32x1xf32> to vector<32x16xf32>
    %62 = arith.addf %60, %61 : vector<32x16xf32>
    %63 = tpu.transpose %62, [1, 0] : vector<32x16xf32> -> vector<16x32xf32>
    %c0_20 = arith.constant 0 : index
    %c0_21 = arith.constant 0 : index
    %64 = vector.load %arg5[%c0_20, %c0_21] : memref<16x32xf32, #tpu.memory_space<vmem>>, vector<16x32xf32>
    tpu.vector_store %arg5[%c0_20, %c0_21], %63 {strides = array<i32>} : memref<16x32xf32, #tpu.memory_space<vmem>>, vector<16x32xf32>,
    return
  }
}

</mosaic_0001>

<bundles_post_ra>
// kernel: self_attention.1
= control target key start
LH: loop header
LB: loop body
LE: loop exit
PB: predicated region body
PF: predicated region fallthrough
CT: control target
= control target key end

     0   :  { %s7944_s0 = inlined_call_operand.vmem [shape: f32[16,32], index: 0, kind: input, shape index: {}]   ;;  %s7945_s1 = inlined_call_operand.vmem [shape: f32[96,32], index: 1, kind: input, shape index: {}]   ;;  %s7946_s2 = inlined_call_operand.vmem [shape: f32[32,32], index: 2, kind: input, shape index: {}]   ;;  %s7947_s3 = inlined_call_operand.vmem [shape: f32[192,1], index: 3, kind: input, shape index: {}]   ;;  %s7948_s4 = inlined_call_operand.vmem [shape: f32[16,16], index: 4, kind: input, shape index: {}]   ;;  %s7949_s5 = inlined_call_operand.hbm [shape: f32[16,32], index: 5, kind: output, shape index: {}]  }
   0x1   :  { %v21_v0 = vld [vmem:[%s7944_s0] sm:$0xff] }
   0x2   :  { %10 = vsyncpa [#allocation3], 0  ;;  %23 = vxpose.xlu0.b32.start [1/2] (short) (narrow) %v21_v0, 32  ;;  %v22_v1 = vld [vmem:[%s7944_s0 + $0x8] sm:$0xff]  ;;  %v79_v2 = vld [vmem:[%s7945_s1] sm:$0xff]  ;;  %vm151_vm0 = vcmask 261120  }
   0x3   :  { %v153_v3 = vsel %vm151_vm0, %v79_v2, 0  ;;  %v59_v9 = vld [vmem:[%s7947_s3 + $0x20] sm:$0xff]  ;;  %v6885_v10 = vmov 0   ;;  %v60_v11 = vld [vmem:[%s7947_s3 + $0x28] sm:$0xff]  ;;  %v62_v13 = vld [vmem:[%s7947_s3 + $0x38] sm:$0xff]  ;;  %vm1280_vm1 = vcmask 64512  }
   0x4   :  { %v6931_v4 = vand.u32 4294901760, %v153_v3  ;;  %6835 = vset.pattern.permute.xlu1 %v6885_v10  ;;  %v55_v12 = vld [vmem:[%s7947_s3] sm:$0xff]  ;;  %v56_v14 = vld [vmem:[%s7947_s3 + $0x8] sm:$0xff]  ;;  %v61_v15 = vld [vmem:[%s7947_s3 + $0x30] sm:$0xff]  ;;  %vm6887_vm2 = vmmov 0   ;;  %vm3261_vm3 = vcmask 130048  }
   0x5   :  { %113 = vperm.xlu1 %6835, %v59_v9   ;;  %v57_v16 = vld [vmem:[%s7947_s3 + $0x10] sm:$0xff]  ;;  %v58_v17 = vld [vmem:[%s7947_s3 + $0x18] sm:$0xff]  ;;  %v80_v18 = vld [vmem:[%s7945_s1 + $0x8] sm:$0xff] }
   0x6   :  { %24 = vxpose.xlu0.b32.end [2/2] (short) (narrow) %v22_v1, 32  ;;  %v6934_v5 = vsub.f32 %v153_v3, %v6931_v4  ;;  %6335 = vmatprep.mubr.f32.mxu1 %v6931_v4  ;;  %v156_v19 = vsel %vm151_vm0, %v80_v18, 0  ;;  %v81_v21 = vld [vmem:[%s7945_s1 + $0x10] sm:$0xff]  ;;  %v82_v23 = vld [vmem:[%s7945_s1 + $0x18] sm:$0xff]  ;;  %v83_v26 = vld [vmem:[%s7945_s1 + $0x20] sm:$0xff] }
   0x7   :  { %v6974_v22 = vand.u32 4294901760, %v156_v19  ;;  %v159_v24 = vsel %vm151_vm0, %v81_v21, 0  ;;  %v162_v28 = vsel %vm151_vm0, %v82_v23, 0  ;;  %v165_v30 = vsel %vm151_vm0, %v83_v26, 0  ;;  %v84_v31 = vld [vmem:[%s7945_s1 + $0x28] sm:$0xff]  ;;  %v85_v36 = vld [vmem:[%s7945_s1 + $0x30] sm:$0xff] }
   0x8   :  { %v259_v6 = vand.u32 4294901760, %v6934_v5  ;;  %v6989_v29 = vand.u32 4294901760, %v159_v24  ;;  %v6997_v33 = vand.u32 4294901760, %v162_v28  ;;  %v7012_v39 = vand.u32 4294901760, %v165_v30  ;;  %v86_v42 = vld [vmem:[%s7945_s1 + $0x38] sm:$0xff]  ;;  %v87_v50 = vld [vmem:[%s7945_s1 + $0x40] sm:$0xff] }
   0x9   :  { %118 = vperm.xlu1 %6835, %v60_v11   ;;  %v6986_v27 = vsub.f32 %v156_v19, %v6974_v22  ;;  %v168_v40 = vsel %vm151_vm0, %v84_v31, 0  ;;  %v171_v46 = vsel %vm151_vm0, %v85_v36, 0  ;;  %v174_v54 = vsel %vm151_vm0, %v86_v42, 0  ;;  %v88_v58 = vld [vmem:[%s7945_s1 + $0x48] sm:$0xff]  ;;  %v89_v2 = vld [vmem:[%s7945_s1 + $0x50] sm:$0xff] }
   0xa   :  { %v260_v7 = vsub.f32 %v6934_v5, %v259_v6  ;;  %v7010_v38 = vsub.f32 %v159_v24, %v6989_v29  ;;  %v7028_v45 = vsub.f32 %v162_v28, %v6997_v33  ;;  %v7037_v49 = vand.u32 4294901760, %v168_v40 }
   0xb   :  { %v269_v35 = vand.u32 4294901760, %v6986_v27  ;;  %v7048_v53 = vsub.f32 %v165_v30, %v7012_v39  ;;  %v7057_v57 = vand.u32 4294901760, %v171_v46  ;;  %v177_v61 = vsel %vm151_vm0, %v87_v50, 0 }
   0xc   :  { %v261_v8 = vand.u32 4294901760, %v260_v7  ;;  %v279_v52 = vand.u32 4294901760, %v7010_v38  ;;  %v289_v60 = vand.u32 4294901760, %v7028_v45  ;;  %v7073_v0 = vsub.f32 %v168_v40, %v7037_v49 }
   0xd   :  { %93 = vperm.xlu1 %6835, %v55_v12   ;;  %v270_v48 = vsub.f32 %v6986_v27, %v269_v35  ;;  %v7075_v1 = vand.u32 4294901760, %v174_v54  ;;  %v180_v9 = vsel %vm151_vm0, %v88_v58, 0  ;;  %v7094_v12 = vsub.f32 %v171_v46, %v7057_v57 }
   0xe   :  { %6309 = vmatprep.mubr.f32.mxu0 %v261_v8  ;;  %v280_v3 = vsub.f32 %v7010_v38, %v279_v52  ;;  %v299_v8 = vand.u32 4294901760, %v7048_v53  ;;  %v309_v19 = vand.u32 4294901760, %v7073_v0  ;;  %v7114_v23 = vand.u32 4294901760, %v180_v9 }
   0xf   :  { %v271_v62 = vand.u32 4294901760, %v270_v48  ;;  %v7112_v21 = vsub.f32 %v174_v54, %v7075_v1  ;;  %v319_v36 = vand.u32 4294901760, %v7094_v12 }
  0x10   :  { %v281_v24 = vand.u32 4294901760, %v280_v3  ;;  %v300_v28 = vsub.f32 %v7048_v53, %v299_v8  ;;  %v310_v50 = vsub.f32 %v7073_v0, %v309_v19  ;;  %v7136_v58 = vsub.f32 %v180_v9, %v7114_v23 }
  0x11   :  { %128 = vperm.xlu1 %6835, %v62_v13   ;;  %v7096_v13 = vand.u32 4294901760, %v177_v61  ;;  %v329_v54 = vand.u32 4294901760, %v7112_v21 }
  0x13   :  { %v7125_v40 = vsub.f32 %v177_v61, %v7096_v13 }
  0x15   :  { %98 = vperm.xlu1 %6835, %v56_v14   ;;  %v90_v14 = vld [vmem:[%s7945_s1 + $0x58] sm:$0xff]  ;;  %v339_v3 = vand.u32 4294901760, %v7125_v40 }
  0x16   :  { %v186_v30 = vsel %vm151_vm0, %v90_v14, 0  ;;  %v349_v14 = vand.u32 4294901760, %v7136_v58 }
  0x17   :  { %v7138_v61 = vand.u32 4294901760, %v186_v30 }
  0x19   :  { %103 = vperm.xlu1 %6835, %v57_v16  }
  0x1d   :  { %108 = vperm.xlu1 %6835, %v58_v17   ;;  %v183_v17 = vsel %vm151_vm0, %v89_v2, 0  ;;  %v320_v2 = vsub.f32 %v7094_v12, %v319_v36 }
  0x1e   :  { %v7127_v42 = vand.u32 4294901760, %v183_v17 }
  0x2f   :  { %6836 = vset.pattern.permute.xlu0 %v6885_v10 }
  0x37   :  { %123 = vperm.xlu0 %6836, %v61_v15   ;;  %v290_v15 = vsub.f32 %v7028_v45, %v289_v60 }
  0x39   :  { %v291_v46 = vand.u32 4294901760, %v290_v15  ;;  %v7155_v15 = vsub.f32 %v186_v30, %v7138_v61 }
  0x7e   :  { %v6969_v20 = vpop.trf.xlu0 }
  0x7f   :  { %v7023_v43 = vand.u32 4294901760, %v6969_v20 }
  0x81   :  { %v7064_v59 = vsub.f32 %v6969_v20, %v7023_v43 }
  0x82   :  { %v6980_v25 = vpop.trf.xlu0 }
  0x83   :  { %v7007_v37 = vand.u32 4294901760, %v6980_v25  ;;  %v7106_v16 = vand.u32 4294901760, %v7064_v59 }
  0x85   :  { %v7044_v51 = vsub.f32 %v6980_v25, %v7007_v37  ;;  %v426_v48 = vsub.f32 %v7064_v59, %v7106_v16 }
  0x86   :  { %v6995_v32 = vpop.trf.xlu0 }
  0x87   :  { %7954 = vst [vmem:[#allocation5_spill] sm:$0xff] %v6995_v32  ;;  %v7000_v34 = vand.u32 4294901760, %v6995_v32  ;;  %v7085_v7 = vand.u32 4294901760, %v7044_v51  ;;  %v427_v9 = vand.u32 4294901760, %v426_v48 }
  0x89   :  { %v7017_v41 = vsub.f32 %v6995_v32, %v7000_v34  ;;  %v419_v26 = vsub.f32 %v7044_v51, %v7085_v7 }
  0x8a   :  { %v7025_v44 = vpop.trf.xlu0 }
  0x8b   :  { %7955 = vst [vmem:[#allocation6_spill] sm:$0xff] %v7025_v44  ;;  %v7032_v47 = vand.u32 4294901760, %v7025_v44  ;;  %v7055_v56 = vand.u32 4294901760, %v7017_v41 }
  0x8d   :  { %v403_v55 = vsub.f32 %v7025_v44, %v7032_v47  ;;  %6301 = vmatprep.subr.mxu0 %v7032_v47  ;;  %v412_v11 = vsub.f32 %v7017_v41, %v7055_v56 }
  0x8e   :  { %6302 = vmatpush3.msra.mxu0 %v7032_v47 }
  0x8f   :  { %6303 = vmatprep.subr.mxu0 %v7000_v34  ;;  %v7070_v63 = vand.u32 4294901760, %v403_v55  ;;  %v413_v31 = vand.u32 4294901760, %v412_v11  ;;  %v311_v11 = vand.u32 4294901760, %v310_v50 }
  0x90   :  { %6304 = vmatpush3.msra.mxu0 %v7000_v34 }
  0x91   :  { %6305 = vmatprep.subr.mxu0 %v7007_v37  ;;  %v405_v10 = vsub.f32 %v403_v55, %v7070_v63 }
  0x92   :  { %6306 = vmatpush3.msra.mxu0 %v7007_v37 }
  0x93   :  { %6307 = vmatprep.subr.mxu0 %v7023_v43  ;;  %v406_v18 = vand.u32 4294901760, %v405_v10  ;;  %v7147_v10 = vsub.f32 %v183_v17, %v7127_v42  ;;  %v321_v17 = vand.u32 4294901760, %v320_v2 }
  0x94   :  { %6308 = vmatpush3.msra.mxu0 %v7023_v43 }
  0x95   :  { %6310 = vmatmul.mubr.f32.vlgmr.msra.gmra.mxu0 %v271_v62  ;;  %6327 = vmatprep.subr.mxu1 %v406_v18  ;;  %v420_v62 = vand.u32 4294901760, %v419_v26 }
  0x96   :  { %6353 = vmatprep.subr.mxu0 %v403_v55  ;;  %6328 = vmatpush3.msra.mxu1 %v406_v18  ;;  %v340_v18 = vsub.f32 %v7125_v40, %v339_v3 }
  0x97   :  { %6354 = vmatpush3.msra.mxu0 %v403_v55  ;;  %6329 = vmatprep.subr.mxu1 %v413_v31  ;;  %v301_v55 = vand.u32 4294901760, %v300_v28  ;;  %v369_v28 = vand.u32 4294901760, %v7155_v15 }
  0x98   :  { %6355 = vmatprep.subr.mxu0 %v7017_v41  ;;  %6312 = vmatprep.mubr.f32.mxu0 %v281_v24  ;;  %v359_v24 = vand.u32 4294901760, %v7147_v10  ;;  %v341_v30 = vand.u32 4294901760, %v340_v18 }
  0x99   :  { %6330 = vmatpush3.msra.mxu1 %v413_v31  ;;  %6356 = vmatpush3.msra.mxu0 %v7017_v41  ;;  %v330_v41 = vsub.f32 %v7112_v21, %v329_v54 }
  0x9a   :  { %6313 = vmatmul.mubr.f32.gmra.mxu0 %v291_v46  ;;  %6331 = vmatprep.subr.mxu1 %v420_v62  ;;  %v370_v46 = vsub.f32 %v7155_v15, %v369_v28 }
  0x9b   :  { %6357 = vmatprep.subr.mxu0 %v7044_v51  ;;  %6332 = vmatpush3.msra.mxu1 %v420_v62  ;;  %v331_v26 = vand.u32 4294901760, %v330_v41 }
  0x9c   :  { %6358 = vmatpush3.msra.mxu0 %v7044_v51  ;;  %6333 = vmatprep.subr.mxu1 %v427_v9  ;;  %v350_v51 = vsub.f32 %v7136_v58, %v349_v14  ;;  %v371_v50 = vand.u32 4294901760, %v370_v46 }
  0x9d   :  { %6359 = vmatprep.subr.mxu0 %v7064_v59  ;;  %6315 = vmatprep.mubr.f32.mxu0 %v301_v55 }
  0x9e   :  { %6334 = vmatpush3.msra.mxu1 %v427_v9  ;;  %6360 = vmatpush3.msra.mxu0 %v7064_v59  ;;  %v360_v59 = vsub.f32 %v7147_v10, %v359_v24  ;;  %v351_v31 = vand.u32 4294901760, %v350_v51 }
  0x9f   :  { %6316 = vmatmul.mubr.f32.gmra.mxu0 %v311_v11  ;;  %6336 = vmatmul.mubr.f32.vlgmr.msra.gmra.mxu1 %v6974_v22 }
  0xa0   :  { %6379 = vmatprep.subr.mxu1 %v7032_v47  ;;  %6405 = vmatprep.subr.mxu0 %v7070_v63  ;;  %v361_v48 = vand.u32 4294901760, %v360_v59 }
  0xa1   :  { %6380 = vmatpush3.msra.mxu1 %v7032_v47  ;;  %6318 = vmatprep.mubr.f32.mxu0 %v321_v17 }
  0xa2   :  { %6381 = vmatprep.subr.mxu1 %v7000_v34  ;;  %6338 = vmatprep.mubr.f32.mxu1 %v6989_v29 }
  0xa3   :  { %6382 = vmatpush3.msra.mxu1 %v7000_v34  ;;  %6319 = vmatmul.mubr.f32.gmra.mxu0 %v331_v26 }
  0xa4   :  { %6339 = vmatmul.mubr.f32.gmra.mxu1 %v6997_v33  ;;  %6383 = vmatprep.subr.mxu1 %v7007_v37 }
  0xa5   :  { %6384 = vmatpush3.msra.mxu1 %v7007_v37  ;;  %6321 = vmatprep.mubr.f32.mxu0 %v341_v30 }
  0xa6   :  { %6385 = vmatprep.subr.mxu1 %v7023_v43  ;;  %6341 = vmatprep.mubr.f32.mxu1 %v7012_v39 }
  0xa7   :  { %6386 = vmatpush3.msra.mxu1 %v7023_v43  ;;  %6322 = vmatmul.mubr.f32.gmra.mxu0 %v351_v31 }
  0xa8   :  { %6342 = vmatmul.mubr.f32.gmra.mxu1 %v7037_v49  ;;  %6431 = vmatprep.subr.mxu1 %v7032_v47 }
  0xa9   :  { %6324 = vmatprep.mubr.f32.mxu0 %v361_v48  ;;  %6344 = vmatprep.mubr.f32.mxu1 %v7057_v57 }
  0xab   :  { %6325 = vmatmul.mubr.f32.gmra.mxu0 %v371_v50 }
  0xac   :  { %6345 = vmatmul.mubr.f32.gmra.mxu1 %v7075_v1  ;;  %6361 = vmatprep.mubr.f32.mxu0 %v6934_v5 }
  0xad   :  { %6347 = vmatprep.mubr.f32.mxu1 %v7096_v13 }
  0xaf   :  { %6362 = vmatmul.mubr.f32.vlgmr.msra.gmra.mxu0 %v6986_v27 }
  0xb0   :  { %6348 = vmatmul.mubr.f32.gmra.mxu1 %v7114_v23  ;;  %6406 = vmatpush3.msra.mxu0 %v7070_v63 }
  0xb1   :  { %6407 = vmatprep.subr.mxu0 %v7055_v56  ;;  %6350 = vmatprep.mubr.f32.mxu1 %v7127_v42 }
  0xb2   :  { %6408 = vmatpush3.msra.mxu0 %v7055_v56  ;;  %6364 = vmatprep.mubr.f32.mxu0 %v7010_v38 }
  0xb3   :  { %6409 = vmatprep.subr.mxu0 %v7085_v7  ;;  %6365 = vmatmul.mubr.f32.gmra.mxu0 %v7028_v45 }
  0xb4   :  { %6351 = vmatmul.mubr.f32.gmra.mxu1 %v7138_v61  ;;  %6410 = vmatpush3.msra.mxu0 %v7085_v7 }
  0xb5   :  { %6411 = vmatprep.subr.mxu0 %v7106_v16  ;;  %6367 = vmatprep.mubr.f32.mxu0 %v7048_v53 }
  0xb6   :  { %6412 = vmatpush3.msra.mxu0 %v7106_v16  ;;  %6387 = vmatprep.mubr.f32.mxu1 %v259_v6 }
  0xb7   :  { %6368 = vmatmul.mubr.f32.gmra.mxu0 %v7073_v0 }
  0xb8   :  { %6388 = vmatmul.mubr.f32.vlgmr.msra.gmra.mxu1 %v269_v35  ;;  %6370 = vmatprep.mubr.f32.mxu0 %v7094_v12 }
  0xb9   :  { %6432 = vmatpush3.msra.mxu1 %v7032_v47  ;;  %6390 = vmatprep.mubr.f32.mxu1 %v279_v52 }
  0xba   :  { %6433 = vmatprep.subr.mxu1 %v7000_v34 }
  0xbb   :  { %6434 = vmatpush3.msra.mxu1 %v7000_v34  ;;  %6371 = vmatmul.mubr.f32.gmra.mxu0 %v7112_v21 }
  0xbc   :  { %6435 = vmatprep.subr.mxu1 %v7007_v37  ;;  %6391 = vmatmul.mubr.f32.gmra.mxu1 %v289_v60 }
  0xbd   :  { %6436 = vmatpush3.msra.mxu1 %v7007_v37  ;;  %6373 = vmatprep.mubr.f32.mxu0 %v7125_v40 }
  0xbe   :  { %6437 = vmatprep.subr.mxu1 %v7023_v43  ;;  %6393 = vmatprep.mubr.f32.mxu1 %v299_v8 }
  0xbf   :  { %6438 = vmatpush3.msra.mxu1 %v7023_v43  ;;  %6374 = vmatmul.mubr.f32.gmra.mxu0 %v7136_v58 }
  0xc0   :  { %6394 = vmatmul.mubr.f32.gmra.mxu1 %v309_v19  ;;  %6376 = vmatprep.mubr.f32.mxu0 %v7147_v10 }
  0xc1   :  { %6396 = vmatprep.mubr.f32.mxu1 %v319_v36 }
  0xc3   :  { %6377 = vmatmul.mubr.f32.gmra.mxu0 %v7155_v15 }
  0xc4   :  { %6397 = vmatmul.mubr.f32.gmra.mxu1 %v329_v54  ;;  %6413 = vmatprep.mubr.f32.mxu0 %v6931_v4 }
  0xc5   :  { %6399 = vmatprep.mubr.f32.mxu1 %v339_v3 }
  0xc7   :  { %6414 = vmatmul.mubr.f32.vlgmr.msra.gmra.mxu0 %v6974_v22 }
  0xc8   :  { %6400 = vmatmul.mubr.f32.gmra.mxu1 %v349_v14  ;;  %6416 = vmatprep.mubr.f32.mxu0 %v6989_v29 }
  0xc9   :  { %6402 = vmatprep.mubr.f32.mxu1 %v359_v24 }
  0xcb   :  { %6417 = vmatmul.mubr.f32.gmra.mxu0 %v6997_v33 }
  0xcc   :  { %6403 = vmatmul.mubr.f32.gmra.mxu1 %v369_v28  ;;  %6419 = vmatprep.mubr.f32.mxu0 %v7012_v39 }
  0xcd   :  { %6439 = vmatprep.mubr.f32.mxu1 %v6931_v4  ;;  %v7269_v4 = vpop.permute.xlu1 %113 }
  0xcf   :  { %6420 = vmatmul.mubr.f32.gmra.mxu0 %v7037_v49 }
  0xd0   :  { %6440 = vmatmul.mubr.f32.vlgmr.msra.gmra.mxu1 %v6974_v22  ;;  %6422 = vmatprep.mubr.f32.mxu0 %v7057_v57 }
  0xd1   :  { %6442 = vmatprep.mubr.f32.mxu1 %v6989_v29  ;;  %v7271_v5 = vpop.permute.xlu1 %118 }
  0xd3   :  { %6423 = vmatmul.mubr.f32.gmra.mxu0 %v7075_v1 }
  0xd4   :  { %6443 = vmatmul.mubr.f32.gmra.mxu1 %v6997_v33  ;;  %6425 = vmatprep.mubr.f32.mxu0 %v7096_v13 }
  0xd5   :  { %6445 = vmatprep.mubr.f32.mxu1 %v7012_v39  ;;  %v7273_v6 = vpop.permute.xlu1 %93 }
  0xd7   :  { %6426 = vmatmul.mubr.f32.gmra.mxu0 %v7114_v23 }
  0xd8   :  { %6446 = vmatmul.mubr.f32.gmra.mxu1 %v7037_v49  ;;  %6428 = vmatprep.mubr.f32.mxu0 %v7127_v42 }
  0xd9   :  { %6448 = vmatprep.mubr.f32.mxu1 %v7057_v57  ;;  %v7275_v22 = vpop.permute.xlu1 %128 }
  0xdb   :  { %6429 = vmatmul.mubr.f32.gmra.mxu0 %v7138_v61 }
  0xdc   :  { %6449 = vmatmul.mubr.f32.gmra.mxu1 %v7075_v1 }
  0xdd   :  { %6451 = vmatprep.mubr.f32.mxu1 %v7096_v13  ;;  %v99_v27 = vpop.permute.xlu1 %98 }
  0xe0   :  { %6452 = vmatmul.mubr.f32.gmra.mxu1 %v7114_v23 }
  0xe1   :  { %6454 = vmatprep.mubr.f32.mxu1 %v7127_v42  ;;  %v104_v34 = vpop.permute.xlu1 %103 }
  0xe4   :  { %6455 = vmatmul.mubr.f32.gmra.mxu1 %v7138_v61 }
  0xe5   :  { %v109_v39 = vpop.permute.xlu1 %108 }
 0x155   :  { %v6311_v29 = vpop.f32.mrf.mxu0 }
 0x156   :  { %v274_v37 = vadd.f32 %v6311_v29, %v99_v27 }
 0x157   :  { %v263_v33 = vpop.f32.mrf.mxu0 }
 0x15a   :  { %v6314_v35 = vpop.f32.mrf.mxu0 }
 0x15b   :  { %v294_v49 = vadd.f32 %v6314_v35, %v109_v39  ;;  %v264_v39 = vadd.f32 %v263_v33, %v7273_v6 }
 0x15c   :  { %v283_v38 = vpop.f32.mrf.mxu0 }
 0x15d   :  { %v284_v60 = vadd.f32 %v283_v38, %v104_v34 }
 0x15f   :  { %v6317_v43 = vpop.f32.mrf.mxu0  ;;  %v6337_v45 = vpop.f32.mrf.mxu1 }
 0x160   :  { %v471_v47 = vadd.f32 %v6337_v45, %v274_v37 }
 0x161   :  { %v7277_v52 = vpop.f32.mrf.mxu0  ;;  %v464_v53 = vpop.f32.mrf.mxu1 }
 0x162   :  { %v304_v6 = vadd.f32 %v7277_v52, %v7269_v4 }
 0x163   :  { %v7279_v56 = vpop.f32.mrf.mxu0 }
 0x164   :  { %v6340_v57 = vpop.f32.mrf.mxu1 }
 0x165   :  { %v483_v63 = vadd.f32 %v6340_v57, %v294_v49  ;;  %v7281_v0 = vpop.f32.mrf.mxu0  ;;  %v465_v49 = vadd.f32 %v464_v53, %v264_v39 }
 0x166   :  { %v476_v1 = vpop.f32.mrf.mxu1 }
 0x167   :  { %v477_v7 = vadd.f32 %v476_v1, %v284_v60  ;;  %v7283_v8 = vpop.f32.mrf.mxu0  ;;  %v314_v1 = vadd.f32 %v6317_v43, %v7271_v5 }
 0x168   :  { %v6343_v12 = vpop.f32.mrf.mxu1 }
 0x169   :  { %v7285_v13 = vpop.f32.mrf.mxu0  ;;  %v495_v33 = vadd.f32 %v6343_v12, %v314_v1 }
 0x16a   :  { %v488_v16 = vpop.f32.mrf.mxu1 }
 0x16b   :  { %v7287_v19 = vpop.f32.mrf.mxu0 }
 0x16c   :  { %v7289_v21 = vpop.f32.mrf.mxu1 }
 0x16d   :  { %v7291_v23 = vpop.f32.mrf.mxu0 }
 0x16e   :  { %v7293_v36 = vpop.f32.mrf.mxu1 }
 0x16f   :  { %v6363_v40 = vpop.f32.mrf.mxu0 }
 0x170   :  { %v7295_v42 = vpop.f32.mrf.mxu1  ;;  %v618_v54 = vadd.f32 %v6363_v40, %v471_v47 }
 0x171   :  { %v610_v58 = vpop.f32.mrf.mxu0 }
 0x172   :  { %v7297_v61 = vpop.f32.mrf.mxu1 }
 0x173   :  { %v6366_v62 = vpop.f32.mrf.mxu0 }
 0x174   :  { %v7299_v55 = vpop.f32.mrf.mxu1  ;;  %v632_v2 = vadd.f32 %v6366_v62, %v483_v63 }
 0x175   :  { %v624_v3 = vpop.f32.mrf.mxu0 }
 0x176   :  { %v7301_v10 = vpop.f32.mrf.mxu1  ;;  %v625_v9 = vadd.f32 %v624_v3, %v477_v7  ;;  %v611_v7 = vadd.f32 %v610_v58, %v465_v49 }
 0x177   :  { %v6369_v11 = vpop.f32.mrf.mxu0 }
 0x178   :  { %v6389_v41 = vpop.f32.mrf.mxu1  ;;  %v646_v5 = vadd.f32 %v6369_v11, %v495_v33 }
 0x179   :  { %v773_v14 = vadd.f32 %v6389_v41, %v618_v54  ;;  %v638_v15 = vpop.f32.mrf.mxu0  ;;  %v124_v41 = vpop.permute.xlu0 %123 }
 0x17a   :  { %v764_v17 = vpop.f32.mrf.mxu1  ;;  %v324_v58 = vadd.f32 %v7281_v0, %v124_v41 }
 0x17b   :  { %v7303_v18 = vpop.f32.mrf.mxu0 }
 0x17c   :  { %v6392_v24 = vpop.f32.mrf.mxu1  ;;  %v501_v4 = vadd.f32 %v7293_v36, %v324_v58  ;;  %v74_v58 = vld [vmem:[%s7947_s3 + $0x98] sm:$0xff] }
 0x17d   :  { %v789_v26 = vadd.f32 %v6392_v24, %v632_v2  ;;  %v652_v51 = vpop.f32.mrf.mxu0  ;;  %v765_v2 = vadd.f32 %v764_v17, %v611_v7 }
 0x17e   :  { %v780_v28 = vpop.f32.mrf.mxu1  ;;  %v653_v11 = vadd.f32 %v652_v51, %v501_v4  ;;  %v75_v4 = vld [vmem:[%s7947_s3 + $0xa0] sm:$0xff] }
 0x17f   :  { %v781_v30 = vadd.f32 %v780_v28, %v625_v9  ;;  %v7305_v59 = vpop.f32.mrf.mxu0  ;;  %v489_v28 = vadd.f32 %v488_v16, %v304_v6  ;;  %v334_v16 = vadd.f32 %v7279_v56, %v7275_v22 }
 0x180   :  { %v6395_v31 = vpop.f32.mrf.mxu1 }
 0x181   :  { %v7307_v46 = vpop.f32.mrf.mxu0  ;;  %v805_v17 = vadd.f32 %v6395_v31, %v646_v5  ;;  %v507_v51 = vadd.f32 %v7289_v21, %v334_v16  ;;  %v64_v21 = vld [vmem:[%s7947_s3 + $0x48] sm:$0xff]  ;;  %v73_v5 = vld [vmem:[%s7947_s3 + $0x90] sm:$0xff] }
 0x182   :  { %v796_v48 = vpop.f32.mrf.mxu1 }
 0x183   :  { %v7309_v50 = vpop.f32.mrf.mxu0 }
 0x184   :  { %v7311_v27 = vpop.f32.mrf.mxu1 }
 0x185   :  { %v7313_v29 = vpop.f32.mrf.mxu0 }
 0x186   :  { %v812_v34 = vpop.f32.mrf.mxu1 }
 0x187   :  { %v6415_v35 = vpop.f32.mrf.mxu0 }
 0x188   :  { %v7315_v37 = vpop.f32.mrf.mxu1  ;;  %v942_v38 = vadd.f32 %v6415_v35, %v773_v14 }
 0x189   :  { %v935_v45 = vpop.f32.mrf.mxu0 }
 0x18a   :  { %v7318_v47 = vpop.f32.mrf.mxu1  ;;  %v936_v53 = vadd.f32 %v935_v45, %v765_v2 }
 0x18b   :  { %v6418_v57 = vpop.f32.mrf.mxu0 }
 0x18c   :  { %v7320_v60 = vpop.f32.mrf.mxu1  ;;  %v954_v63 = vadd.f32 %v6418_v57, %v789_v26 }
 0x18d   :  { %v947_v40 = vpop.f32.mrf.mxu0 }
 0x18e   :  { %v7323_v54 = vpop.f32.mrf.mxu1  ;;  %v948_v62 = vadd.f32 %v947_v40, %v781_v30  ;;  %v639_v30 = vadd.f32 %v638_v15, %v489_v28  ;;  %v66_v28 = vld [vmem:[%s7947_s3 + $0x58] sm:$0xff] }
 0x18f   :  { %v6421_v3 = vpop.f32.mrf.mxu0 }
 0x190   :  { %v6441_v9 = vpop.f32.mrf.mxu1  ;;  %v797_v45 = vadd.f32 %v796_v48, %v639_v30  ;;  %v813_v48 = vadd.f32 %v812_v34, %v653_v11  ;;  %v78_v30 = vld [vmem:[%s7947_s3 + $0xb8] sm:$0xff] }
 0x191   :  { %v7327_v14 = vadd.f32 %v6441_v9, %v942_v38  ;;  %v959_v24 = vpop.f32.mrf.mxu0  ;;  %v966_v38 = vadd.f32 %v6421_v3, %v805_v17  ;;  %v660_v9 = vadd.f32 %v7303_v18, %v507_v51  ;;  %v63_v18 = vld [vmem:[%s7947_s3 + $0x40] sm:$0xff]  ;;  %v69_v17 = vld [vmem:[%s7947_s3 + $0x70] sm:$0xff] }
 0x192   :  { %v1076_v26 = vpop.f32.mrf.mxu1  ;;  %v960_v15 = vadd.f32 %v959_v24, %v797_v45  ;;  %v65_v24 = vld [vmem:[%s7947_s3 + $0x50] sm:$0xff] }
 0x193   :  { %v1077_v43 = vadd.f32 %v1076_v26, %v936_v53  ;;  %v6424_v52 = vpop.f32.mrf.mxu0  ;;  %v821_v33 = vadd.f32 %v7311_v27, %v660_v9  ;;  %v70_v27 = vld [vmem:[%s7947_s3 + $0x78] sm:$0xff]  ;;  %v72_v26 = vld [vmem:[%s7947_s3 + $0x88] sm:$0xff]  ;;  %v1147_v45 = vmul.f32 0.35355338, %v7327_v14 }
 0x194   :  { %v6444_v35 = vpop.f32.mrf.mxu1 }
 0x195   :  { %v1146_v39 = vmul.f32 0.35355338, %v1077_v43  ;;  %v7330_v49 = vadd.f32 %v6444_v35, %v954_v63  ;;  %v971_v36 = vpop.f32.mrf.mxu0  ;;  %v978_v41 = vadd.f32 %v6424_v52, %v821_v33  ;;  %v67_v43 = vld [vmem:[%s7947_s3 + $0x60] sm:$0xff]  ;;  %v68_v35 = vld [vmem:[%s7947_s3 + $0x68] sm:$0xff] }
 0x196   :  { %v1088_v12 = vpop.f32.mrf.mxu1  ;;  %v76_v52 = vld [vmem:[%s7947_s3 + $0xa8] sm:$0xff] }
 0x197   :  { %v7333_v57 = vand.u32 4294901760, %v1146_v39  ;;  %v7335_v1 = vadd.f32 %v1088_v12, %v948_v62  ;;  %v972_v62 = vadd.f32 %v971_v36, %v813_v48  ;;  %v77_v12 = vld [vmem:[%s7947_s3 + $0xb0] sm:$0xff] }
 0x198   :  { %v6447_v0 = vpop.f32.mrf.mxu1 }
 0x199   :  { %v7340_v31 = vsub.f32 %v1146_v39, %v7333_v57  ;;  %v1107_v63 = vadd.f32 %v6447_v0, %v966_v38  ;;  %6457 = vmatprep.subr.mxu0 %v7333_v57  ;;  %v71_v39 = vld [vmem:[%s7947_s3 + $0x80] sm:$0xff]  ;;  %v7403_v38 = vand.u32 4294901760, %v1147_v45  ;;  %v1148_v14 = vmul.f32 0.35355338, %v7335_v1 }
 0x19a   :  { %v1100_v7 = vpop.f32.mrf.mxu1  ;;  %6458 = vmatpush3.msra.mxu0 %v7333_v57 }
 0x19b   :  { %v1101_v40 = vadd.f32 %v1100_v7, %v960_v15  ;;  %1182 = vxpose.xlu0.b32.start.end [1/1] (short) (narrow) %v1107_v63, 16  ;;  %6467 = vmatprep.subr.mxu0 %v7340_v31  ;;  %v7346_v22 = vand.u32 4294901760, %v7340_v31  ;;  %v7406_v0 = vsub.f32 %v1147_v45, %v7403_v38 }
 0x19c   :  { %v6450_v56 = vpop.f32.mrf.mxu1 }
 0x19d   :  { %1150 = vxpose.xlu1.b32.start.end [1/1] (short) (narrow) %v1101_v40, 16  ;;  %v1407_v2 = vsub.f32 %v7340_v31, %v7346_v22  ;;  %v1119_v53 = vadd.f32 %v6450_v56, %v978_v41  ;;  %v7410_v40 = vand.u32 4294901760, %v7406_v0  ;;  %v7420_v41 = vand.u32 4294901760, %v1148_v14 }
 0x19e   :  { %v1112_v3 = vpop.f32.mrf.mxu1 }
 0x19f   :  { %v1113_v6 = vadd.f32 %v1112_v3, %v972_v62  ;;  %v1408_v34 = vand.u32 4294901760, %v1407_v2  ;;  %v1902_v33 = vsub.f32 %v7406_v0, %v7410_v40 }
 0x1a1   :  { %6462 = vmatprep.subr.mxu1 %v1408_v34 }
 0x1a2   :  { %6463 = vmatpush3.msra.mxu1 %v1408_v34  ;;  %1214 = vxpose.xlu1.b32.start.end [1/1] (short) (narrow) %v1113_v6, 16 }
 0x1a3   :  { %6472 = vmatprep.subr.mxu1 %v7333_v57 }
 0x1a7   :  { %1246 = vxpose.xlu1.b32.start.end [1/1] (short) (narrow) %v1119_v53, 16 }
 0x1c8   :  { %138 = vperm.xlu0 %6836, %v64_v21  }
 0x1c9   :  { %133 = vperm.xlu1 %6835, %v63_v18  }
 0x1cc   :  { %5239 = vperm.xlu0 %6836, %v70_v27  }
 0x1cd   :  { %143 = vperm.xlu1 %6835, %v65_v24  }
 0x1d0   :  { %5922 = vperm.xlu0 %6836, %v72_v26   ;;  %v1903_v26 = vand.u32 4294901760, %v1902_v33 }
 0x1d1   :  { %148 = vperm.xlu1 %6835, %v66_v28   ;;  %v7428_v28 = vsub.f32 %v1148_v14, %v7420_v41 }
 0x1d4   :  { %5927 = vperm.xlu0 %6836, %v73_v5  }
 0x1d5   :  { %5224 = vperm.xlu1 %6835, %v67_v43  }
 0x1d8   :  { %5932 = vperm.xlu0 %6836, %v74_v58  }
 0x1d9   :  { %5229 = vperm.xlu1 %6835, %v68_v35  }
 0x1dc   :  { %5956 = vperm.xlu0 %6836, %v78_v30   ;;  %v1149_v30 = vmul.f32 0.35355338, %v7330_v49 }
 0x1dd   :  { %5234 = vperm.xlu1 %6835, %v69_v17  }
 0x1e1   :  { %5917 = vperm.xlu1 %6835, %v71_v39   ;;  %v7436_v39 = vand.u32 4294901760, %v7428_v28 }
 0x1e5   :  { %5941 = vperm.xlu1 %6835, %v75_v4  }
 0x1e9   :  { %5946 = vperm.xlu1 %6835, %v76_v52   ;;  %v7445_v52 = vand.u32 4294901760, %v1149_v30 }
 0x1ed   :  { %5951 = vperm.xlu1 %6835, %v77_v12   ;;  %v2397_v12 = vsub.f32 %v7428_v28, %v7436_v39 }
 0x217   :  { %v1198_v16 = vpop.trf.xlu0 }
 0x218   :  { %v1777_v51 = vsel %vm1280_vm1, %v1198_v16, 0 }
 0x219   :  { %v1166_v11 = vpop.trf.xlu1  ;;  %v7416_v6 = vand.u32 4294901760, %v1777_v51 }
 0x21a   :  { %v1282_v15 = vsel %vm1280_vm1, %v1166_v11, 0 }
 0x21b   :  { %v1353_v63 = vand.u32 4294901760, %v1282_v15  ;;  %v1199_v48 = vpop.trf.xlu0  ;;  %v1849_v24 = vsub.f32 %v1777_v51, %v7416_v6 }
 0x21c   :  { %v1780_v3 = vsel %vm1280_vm1, %v1199_v48, 0 }
 0x21d   :  { %v1354_v36 = vsub.f32 %v1282_v15, %v1353_v63  ;;  %6464 = vmatprep.mubr.f32.mxu1 %v1353_v63  ;;  %v1167_v7 = vpop.trf.xlu1  ;;  %v7424_v21 = vand.u32 4294901760, %v1780_v3  ;;  %v1850_v58 = vand.u32 4294901760, %v1849_v24 }
 0x21e   :  { %v1285_v56 = vsel %vm1280_vm1, %v1167_v7, 0 }
 0x21f   :  { %v1363_v62 = vand.u32 4294901760, %v1285_v56  ;;  %v1355_v2 = vand.u32 4294901760, %v1354_v36  ;;  %v1859_v43 = vsub.f32 %v1780_v3, %v7424_v21 }
 0x221   :  { %v1364_v9 = vsub.f32 %v1285_v56, %v1363_v62  ;;  %6465 = vmatmul.mubr.f32.vlgmr.msra.gmra.mxu1 %v1363_v62  ;;  %v1356_v34 = vsub.f32 %v1354_v36, %v1355_v2  ;;  %v1230_v18 = vpop.trf.xlu1 }
 0x222   :  { %6473 = vmatpush3.msra.mxu1 %v7333_v57  ;;  %6474 = vmatprep.mubr.f32.mxu1 %v1355_v2  ;;  %v2272_v17 = vsel %vm1280_vm1, %v1230_v18, 0 }
 0x223   :  { %v1365_v1 = vand.u32 4294901760, %v1364_v9  ;;  %6482 = vmatprep.subr.mxu1 %v7333_v57  ;;  %v1357_v53 = vand.u32 4294901760, %v1356_v34  ;;  %v7442_v49 = vand.u32 4294901760, %v2272_v17 }
 0x225   :  { %v1366_v27 = vsub.f32 %v1364_v9, %v1365_v1  ;;  %6459 = vmatprep.mubr.f32.mxu0 %v1357_v53  ;;  %6475 = vmatmul.mubr.f32.vlgmr.msra.gmra.mxu1 %v1365_v1  ;;  %v1231_v35 = vpop.trf.xlu1  ;;  %v2344_v15 = vsub.f32 %v2272_v17, %v7442_v49 }
 0x226   :  { %6483 = vmatpush3.msra.mxu1 %v7333_v57  ;;  %6484 = vmatprep.mubr.f32.mxu1 %v1353_v63  ;;  %v1860_v57 = vand.u32 4294901760, %v1859_v43  ;;  %v2275_v4 = vsel %vm1280_vm1, %v1231_v35, 0  ;;  %v7513_v35 = vpop.f32.mrf.mxu0 }
 0x227   :  { %v1367_v5 = vand.u32 4294901760, %v1366_v27  ;;  %6492 = vmatprep.subr.mxu1 %v1903_v26  ;;  %v7452_v16 = vand.u32 4294901760, %v2275_v4  ;;  %v2345_v14 = vand.u32 4294901760, %v2344_v15 }
 0x228   :  { %v1861_v45 = vsub.f32 %v1859_v43, %v1860_v57  ;;  %v7517_v17 = vpop.f32.mrf.mxu0 }
 0x229   :  { %6460 = vmatmul.mubr.f32.vlgmr.msra.gmra.mxu0 %v1367_v5  ;;  %6485 = vmatmul.mubr.f32.vlgmr.msra.gmra.mxu1 %v1363_v62  ;;  %v1262_v11 = vpop.trf.xlu1  ;;  %v2354_v48 = vsub.f32 %v2275_v4, %v7452_v16  ;;  %v7950_v5 = vmov 0.0  }
 0x22a   :  { %6468 = vmatpush3.msra.mxu0 %v7340_v31  ;;  %6493 = vmatpush3.msra.mxu1 %v1903_v26  ;;  %v1851_v31 = vsub.f32 %v1849_v24, %v1850_v58  ;;  %v1862_v7 = vand.u32 4294901760, %v1861_v45  ;;  %v7521_v4 = vpop.f32.mrf.mxu0  ;;  %v7528_v45 = vld [vmem:[%s7948_s4 + $0x8] sm:$0xff] }
 0x22b   :  { %6469 = vmatprep.mubr.f32.mxu0 %v1354_v36  ;;  %6477 = vmatprep.subr.mxu0 %v7346_v22  ;;  %v7457_v36 = vsub.f32 %v1149_v30, %v7445_v52 }
 0x22c   :  { %6494 = vmatprep.mubr.f32.mxu1 %v7416_v6  ;;  %6502 = vmatprep.subr.mxu1 %v7403_v38 }
 0x22d   :  { %6470 = vmatmul.mubr.f32.vlgmr.msra.gmra.mxu0 %v1364_v9  ;;  %6495 = vmatmul.mubr.f32.vlgmr.msra.gmra.mxu1 %v7424_v21  ;;  %v1263_v56 = vpop.trf.xlu1  ;;  %v7468_v51 = vand.u32 4294901760, %v7457_v36 }
 0x22e   :  { %6478 = vmatpush3.msra.mxu0 %v7346_v22  ;;  %6503 = vmatpush3.msra.mxu1 %v7403_v38  ;;  %v1852_v22 = vand.u32 4294901760, %v1851_v31  ;;  %v2770_v2 = vsel %vm1280_vm1, %v1263_v56, 0 }
 0x22f   :  { %6479 = vmatprep.mubr.f32.mxu0 %v1353_v63  ;;  %6487 = vmatprep.subr.mxu0 %v7403_v38  ;;  %v2398_v63 = vand.u32 4294901760, %v2397_v12  ;;  %v2892_v9 = vsub.f32 %v7457_v36, %v7468_v51  ;;  %v2848_v33 = vand.u32 4294901760, %v2770_v2 }
 0x230   :  { %6504 = vmatprep.mubr.f32.mxu1 %v1850_v58  ;;  %6512 = vmatprep.subr.mxu1 %v7403_v38 }
 0x231   :  { %6480 = vmatmul.mubr.f32.vlgmr.msra.gmra.mxu0 %v1363_v62  ;;  %6505 = vmatmul.mubr.f32.vlgmr.msra.gmra.mxu1 %v1860_v57  ;;  %v2355_v62 = vand.u32 4294901760, %v2354_v48  ;;  %v2849_v27 = vsub.f32 %v2770_v2, %v2848_v33 }
 0x232   :  { %6488 = vmatpush3.msra.mxu0 %v7403_v38  ;;  %6513 = vmatpush3.msra.mxu1 %v7403_v38  ;;  %v2767_v38 = vsel %vm1280_vm1, %v1262_v11, 0 }
 0x233   :  { %6489 = vmatprep.mubr.f32.mxu0 %v1852_v22  ;;  %6497 = vmatprep.subr.mxu0 %v7406_v0  ;;  %v2838_v3 = vand.u32 4294901760, %v2767_v38  ;;  %v2356_v34 = vsub.f32 %v2354_v48, %v2355_v62 }
 0x234   :  { %6514 = vmatprep.mubr.f32.mxu1 %v7416_v6  ;;  %6522 = vmatprep.subr.mxu1 %v2398_v63 }
 0x235   :  { %6490 = vmatmul.mubr.f32.vlgmr.msra.gmra.mxu0 %v1862_v7  ;;  %6515 = vmatmul.mubr.f32.vlgmr.msra.gmra.mxu1 %v7424_v21  ;;  %v2839_v1 = vsub.f32 %v2767_v38, %v2838_v3  ;;  %v2357_v18 = vand.u32 4294901760, %v2356_v34 }
 0x236   :  { %6498 = vmatpush3.msra.mxu0 %v7406_v0  ;;  %6523 = vmatpush3.msra.mxu1 %v2398_v63  ;;  %v2346_v0 = vsub.f32 %v2344_v15, %v2345_v14 }
 0x237   :  { %6499 = vmatprep.mubr.f32.mxu0 %v1849_v24  ;;  %6507 = vmatprep.subr.mxu0 %v7410_v40 }
 0x238   :  { %6524 = vmatprep.mubr.f32.mxu1 %v7442_v49  ;;  %6532 = vmatprep.subr.mxu1 %v7420_v41  ;;  %v2347_v53 = vand.u32 4294901760, %v2346_v0 }
 0x239   :  { %6500 = vmatmul.mubr.f32.vlgmr.msra.gmra.mxu0 %v1859_v43  ;;  %6525 = vmatmul.mubr.f32.vlgmr.msra.gmra.mxu1 %v7452_v16  ;;  %v7509_v43 = vpop.f32.mrf.mxu1 }
 0x23a   :  { %6508 = vmatpush3.msra.mxu0 %v7410_v40  ;;  %6533 = vmatpush3.msra.mxu1 %v7420_v41  ;;  %v2893_v40 = vand.u32 4294901760, %v2892_v9 }
 0x23b   :  { %6509 = vmatprep.mubr.f32.mxu0 %v7416_v6  ;;  %6517 = vmatprep.subr.mxu0 %v7420_v41  ;;  %v2840_v6 = vand.u32 4294901760, %v2839_v1  ;;  %v7511_v58 = vpop.f32.mrf.mxu1 }
 0x23c   :  { %6534 = vmatprep.mubr.f32.mxu1 %v2345_v14  ;;  %6542 = vmatprep.subr.mxu1 %v7420_v41 }
 0x23d   :  { %6510 = vmatmul.mubr.f32.vlgmr.msra.gmra.mxu0 %v7424_v21  ;;  %6535 = vmatmul.mubr.f32.vlgmr.msra.gmra.mxu1 %v2355_v62  ;;  %v2850_v21 = vand.u32 4294901760, %v2849_v27  ;;  %v7515_v30 = vpop.f32.mrf.mxu1 }
 0x23e   :  { %6518 = vmatpush3.msra.mxu0 %v7420_v41  ;;  %6543 = vmatpush3.msra.mxu1 %v7420_v41  ;;  %v2841_v41 = vsub.f32 %v2839_v1, %v2840_v6 }
 0x23f   :  { %6519 = vmatprep.mubr.f32.mxu0 %v2347_v53  ;;  %6527 = vmatprep.subr.mxu0 %v7428_v28  ;;  %v2851_v24 = vsub.f32 %v2849_v27, %v2850_v21 }
 0x240   :  { %6544 = vmatprep.mubr.f32.mxu1 %v7442_v49  ;;  %6552 = vmatprep.subr.mxu1 %v2893_v40  ;;  %v2842_v26 = vand.u32 4294901760, %v2841_v41 }
 0x241   :  { %6520 = vmatmul.mubr.f32.vlgmr.msra.gmra.mxu0 %v2357_v18  ;;  %6545 = vmatmul.mubr.f32.vlgmr.msra.gmra.mxu1 %v7452_v16 }
 0x242   :  { %6528 = vmatpush3.msra.mxu0 %v7428_v28  ;;  %6553 = vmatpush3.msra.mxu1 %v2893_v40  ;;  %v2852_v28 = vand.u32 4294901760, %v2851_v24 }
 0x243   :  { %6529 = vmatprep.mubr.f32.mxu0 %v2344_v15  ;;  %6537 = vmatprep.subr.mxu0 %v7436_v39  ;;  %v7533_v15 = vld [vmem:[%s7948_s4] sm:$0xff] }
 0x244   :  { %6554 = vmatprep.mubr.f32.mxu1 %v2838_v3  ;;  %6562 = vmatprep.subr.mxu1 %v7445_v52 }
 0x245   :  { %6530 = vmatmul.mubr.f32.vlgmr.msra.gmra.mxu0 %v2354_v48  ;;  %6555 = vmatmul.mubr.f32.vlgmr.msra.gmra.mxu1 %v2848_v33 }
 0x246   :  { %6538 = vmatpush3.msra.mxu0 %v7436_v39  ;;  %6563 = vmatpush3.msra.mxu1 %v7445_v52  ;;  %v7519_v39 = vpop.f32.mrf.mxu1 }
 0x247   :  { %6539 = vmatprep.mubr.f32.mxu0 %v7442_v49  ;;  %6547 = vmatprep.subr.mxu0 %v7445_v52 }
 0x248   :  { %6564 = vmatprep.mubr.f32.mxu1 %v2840_v6  ;;  %6572 = vmatprep.subr.mxu1 %v7445_v52 }
 0x249   :  { %6540 = vmatmul.mubr.f32.vlgmr.msra.gmra.mxu0 %v7452_v16  ;;  %6565 = vmatmul.mubr.f32.vlgmr.msra.gmra.mxu1 %v2850_v21 }
 0x24a   :  { %6548 = vmatpush3.msra.mxu0 %v7445_v52  ;;  %6573 = vmatpush3.msra.mxu1 %v7445_v52  ;;  %v7523_v52 = vpop.f32.mrf.mxu0 }
 0x24b   :  { %6549 = vmatprep.mubr.f32.mxu0 %v2842_v26  ;;  %6557 = vmatprep.subr.mxu0 %v7457_v36 }
 0x24c   :  { %6574 = vmatprep.mubr.f32.mxu1 %v2838_v3  ;;  %6584 = vmatprep.subr.mxu1 %v7950_v5 }
 0x24d   :  { %6550 = vmatmul.mubr.f32.vlgmr.msra.gmra.mxu0 %v2852_v28  ;;  %6575 = vmatmul.mubr.f32.vlgmr.msra.gmra.mxu1 %v2848_v33 }
 0x24e   :  { %6558 = vmatpush3.msra.mxu0 %v7457_v36  ;;  %6559 = vmatprep.mubr.f32.mxu0 %v2839_v1 }
 0x24f   :  { %6567 = vmatprep.subr.mxu0 %v7468_v51  ;;  %6588 = vmatprep.mubr.msk.f32.mxu1 %vm6887_vm2, %v7950_v5 }
 0x251   :  { %6560 = vmatmul.mubr.f32.vlgmr.msra.gmra.mxu0 %v2849_v27 }
 0x252   :  { %6568 = vmatpush3.msra.mxu0 %v7468_v51  ;;  %6569 = vmatprep.mubr.f32.mxu0 %v2838_v3 }
 0x253   :  { %6577 = vmatprep.subr.mxu0 %v7950_v5 }
 0x255   :  { %6570 = vmatmul.mubr.f32.vlgmr.msra.gmra.mxu0 %v2848_v33 }
 0x256   :  { %6581 = vmatprep.mubr.msk.f32.mxu0 %vm6887_vm2, %v7950_v5 }
 0x2e1   :  { %v6466_v57 = vpop.f32.mrf.mxu1 }
 0x2e3   :  { %v1445_v49 = vpop.f32.mrf.mxu1 }
 0x2e5   :  { %v6476_v31 = vpop.f32.mrf.mxu1 }
 0x2e7   :  { %v1606_v12 = vpop.f32.mrf.mxu1 }
 0x2e9   :  { %v6461_v16 = vpop.f32.mrf.mxu0  ;;  %v6486_v11 = vpop.f32.mrf.mxu1 }
 0x2ea   :  { %v1370_v22 = vadd.f32 %v6461_v16, %v7528_v45 }
 0x2eb   :  { %v1359_v36 = vpop.f32.mrf.mxu0  ;;  %v1766_v63 = vpop.f32.mrf.mxu1 }
 0x2ec   :  { %v1360_v7 = vadd.f32 %v1359_v36, %v7533_v15  ;;  %v1452_v48 = vadd.f32 %v6466_v57, %v1370_v22 }
 0x2ed   :  { %v6471_v14 = vpop.f32.mrf.mxu0  ;;  %v6496_v56 = vpop.f32.mrf.mxu1 }
 0x2ee   :  { %v1533_v38 = vadd.f32 %v6471_v14, %v1452_v48  ;;  %v1446_v51 = vadd.f32 %v1445_v49, %v1360_v7 }
 0x2ef   :  { %v1525_v62 = vpop.f32.mrf.mxu0  ;;  %v1940_v2 = vpop.f32.mrf.mxu1 }
 0x2f0   :  { %v1526_v3 = vadd.f32 %v1525_v62, %v1446_v51  ;;  %v1615_v0 = vadd.f32 %v6476_v31, %v1533_v38 }
 0x2f1   :  { %v6481_v9 = vpop.f32.mrf.mxu0  ;;  %v6506_v34 = vpop.f32.mrf.mxu1 }
 0x2f2   :  { %v1695_v33 = vadd.f32 %v6481_v9, %v1615_v0  ;;  %v1607_v1 = vadd.f32 %v1606_v12, %v1526_v3 }
 0x2f3   :  { %v1688_v53 = vpop.f32.mrf.mxu0  ;;  %v2101_v40 = vpop.f32.mrf.mxu1 }
 0x2f4   :  { %v1773_v18 = vadd.f32 %v6486_v11, %v1695_v33  ;;  %v1689_v27 = vadd.f32 %v1688_v53, %v1607_v1 }
 0x2f5   :  { %v6491_v6 = vpop.f32.mrf.mxu0  ;;  %v6516_v21 = vpop.f32.mrf.mxu1 }
 0x2f6   :  { %v1767_v41 = vadd.f32 %v1766_v63, %v1689_v27  ;;  %v1865_v24 = vadd.f32 %v6491_v6, %v7528_v45  ;;  %v3263_v57 = vsel %vm3261_vm3, %v1773_v18, -inf }
 0x2f7   :  { %v1854_v26 = vpop.f32.mrf.mxu0  ;;  %v2261_v28 = vpop.f32.mrf.mxu1 }
 0x2f8   :  { %v3262_v49 = vsel %vm3261_vm3, %v1767_v41, -inf  ;;  %v1855_v31 = vadd.f32 %v1854_v26, %v7533_v15  ;;  %v1947_v16 = vadd.f32 %v6496_v56, %v1865_v24 }
 0x2f9   :  { %v3264_v12 = vmax.f32 %v3262_v49, %v3263_v57  ;;  %v6501_v22 = vpop.f32.mrf.mxu0  ;;  %v6526_v36 = vpop.f32.mrf.mxu1 }
 0x2fa   :  { %v2028_v11 = vadd.f32 %v6501_v22, %v1947_v16  ;;  %v1941_v7 = vadd.f32 %v1940_v2, %v1855_v31 }
 0x2fb   :  { %v3265_v48 = vrot.slane %v3264_v12, 4  ;;  %v2020_v14 = vpop.f32.mrf.mxu0  ;;  %v2435_v63 = vpop.f32.mrf.mxu1 }
 0x2fc   :  { %v2021_v38 = vadd.f32 %v2020_v14, %v1941_v7  ;;  %v2110_v51 = vadd.f32 %v6506_v34, %v2028_v11 }
 0x2fd   :  { %v3266_v62 = vmax.f32 %v3264_v12, %v3265_v48  ;;  %v6511_v3 = vpop.f32.mrf.mxu0  ;;  %v6536_v0 = vpop.f32.mrf.mxu1 }
 0x2fe   :  { %v2190_v9 = vadd.f32 %v6511_v3, %v2110_v51  ;;  %v2102_v33 = vadd.f32 %v2101_v40, %v2021_v38 }
 0x2ff   :  { %v3267_v1 = vrot.slane %v3266_v62, 2  ;;  %v2183_v53 = vpop.f32.mrf.mxu0  ;;  %v2596_v27 = vpop.f32.mrf.mxu1 }
 0x300   :  { %v7541_v6 = vadd.f32 %v6516_v21, %v2190_v9  ;;  %v2184_v56 = vadd.f32 %v2183_v53, %v2102_v33 }
 0x301   :  { %v3268_v24 = vmax.f32 %v3266_v62, %v3267_v1  ;;  %v6521_v26 = vpop.f32.mrf.mxu0  ;;  %v6546_v57 = vpop.f32.mrf.mxu1 }
 0x302   :  { %v2262_v2 = vadd.f32 %v2261_v28, %v2184_v56  ;;  %v2360_v49 = vadd.f32 %v6521_v26, %v7528_v45  ;;  %v3272_v12 = vsel %vm3261_vm3, %v7541_v6, -inf }
 0x303   :  { %v3269_v31 = vrot.slane %v3268_v24, 1  ;;  %v2349_v16 = vpop.f32.mrf.mxu0  ;;  %v2756_v34 = vpop.f32.mrf.mxu1 }
 0x304   :  { %v3271_v40 = vsel %vm3261_vm3, %v2262_v2, -inf  ;;  %v2350_v22 = vadd.f32 %v2349_v16, %v7533_v15  ;;  %v2442_v11 = vadd.f32 %v6526_v36, %v2360_v49  ;;  %v134_v49 = vpop.permute.xlu1 %133 }
 0x305   :  { %v3270_v21 = vmax.f32 %v3268_v24, %v3269_v31  ;;  %v3273_v7 = vmax.f32 %v3271_v40, %v3272_v12  ;;  %v6531_v48 = vpop.f32.mrf.mxu0  ;;  %v6556_v14 = vpop.f32.mrf.mxu1 }
 0x306   :  { %v2523_v38 = vadd.f32 %v6531_v48, %v2442_v11  ;;  %v2436_v51 = vadd.f32 %v2435_v63, %v2350_v22  ;;  %v344_v22 = vadd.f32 %v7285_v13, %v134_v49 }
 0x307   :  { %v3298_v28 = vsub.f32 %v1767_v41, %v3270_v21  ;;  %v3299_v62 = vsub.f32 %v1773_v18, %v3270_v21  ;;  %v3274_v3 = vrot.slane %v3273_v7, 4  ;;  %v2515_v9 = vpop.f32.mrf.mxu0  ;;  %v2930_v5 = vpop.f32.mrf.mxu1 }
 0x308   :  { %v2516_v33 = vadd.f32 %v2515_v9, %v2436_v51  ;;  %v2605_v1 = vadd.f32 %v6536_v0, %v2523_v38  ;;  %v513_v9 = vadd.f32 %v7297_v61, %v344_v22 }
 0x309   :  { %v3306_v53 = vmul.f32 1.442695, %v3298_v28  ;;  %v3308_v56 = vmul.f32 1.442695, %v3299_v62  ;;  %v3275_v26 = vmax.f32 %v3273_v7, %v3274_v3  ;;  %v6541_v32 = vpop.f32.mrf.mxu0  ;;  %v6566_v63 = vpop.f32.mrf.mxu1 }
 0x30a   :  { %v2685_v44 = vadd.f32 %v6541_v32, %v2605_v1  ;;  %v2597_v16 = vadd.f32 %v2596_v27, %v2516_v33 }
 0x30b   :  { %6837 = vpow2.f32 %v3306_v53  ;;  %v3276_v36 = vrot.slane %v3275_v26, 2  ;;  %v2678_v24 = vpop.f32.mrf.mxu0  ;;  %v3091_v38 = vpop.f32.mrf.mxu1 }
 0x30c   :  { %6839 = vpow2.f32 %v3308_v56  ;;  %v7548_v31 = vadd.f32 %v6546_v57, %v2685_v44  ;;  %v2679_v41 = vadd.f32 %v2678_v24, %v2597_v16 }
 0x30d   :  { %v3277_v18 = vmax.f32 %v3275_v26, %v3276_v36  ;;  %v6551_v12 = vpop.f32.mrf.mxu0 }
 0x30e   :  { %v2757_v40 = vadd.f32 %v2756_v34, %v2679_v41  ;;  %v2855_v0 = vadd.f32 %v6551_v12, %v7528_v45  ;;  %v3281_v32 = vsel %vm3261_vm3, %v7548_v31, -inf }
 0x30f   :  { %v3278_v11 = vrot.slane %v3277_v18, 1  ;;  %v2844_v21 = vpop.f32.mrf.mxu0 }
 0x310   :  { %v3280_v27 = vsel %vm3261_vm3, %v2757_v40, -inf  ;;  %v2845_v7 = vadd.f32 %v2844_v21, %v7533_v15  ;;  %v2937_v44 = vadd.f32 %v6556_v14, %v2855_v0  ;;  %v6576_v15 = vpop.f32.mrf.mxu1 }
 0x311   :  { %v3279_v57 = vmax.f32 %v3277_v18, %v3278_v11  ;;  %v3282_v48 = vmax.f32 %v3280_v27, %v3281_v32  ;;  %v6561_v51 = vpop.f32.mrf.mxu0  ;;  %v139_v11 = vpop.permute.xlu0 %138 }
 0x312   :  { %v3018_v28 = vadd.f32 %v6561_v51, %v2937_v44  ;;  %v2931_v34 = vadd.f32 %v2930_v5, %v2845_v7  ;;  %v3251_v12 = vpop.f32.mrf.mxu1 }
 0x313   :  { %v3300_v62 = vsub.f32 %v2262_v2, %v3279_v57  ;;  %v3301_v45 = vsub.f32 %v7541_v6, %v3279_v57  ;;  %v3283_v13 = vrot.slane %v3282_v48, 4  ;;  %v3010_v3 = vpop.f32.mrf.mxu0  ;;  %v667_v6 = vadd.f32 %v7307_v46, %v513_v9 }
 0x314   :  { %v3011_v33 = vadd.f32 %v3010_v3, %v2931_v34  ;;  %v3100_v1 = vadd.f32 %v6566_v63, %v3018_v28 }
 0x315   :  { %v3310_v53 = vmul.f32 1.442695, %v3300_v62  ;;  %v3312_v56 = vmul.f32 1.442695, %v3301_v45  ;;  %v3284_v26 = vmax.f32 %v3282_v48, %v3283_v13  ;;  %v6571_v14 = vpop.f32.mrf.mxu0  ;;  %v829_v27 = vadd.f32 %v7318_v47, %v667_v6 }
 0x316   :  { %v3180_v16 = vadd.f32 %v6571_v14, %v3100_v1  ;;  %v3092_v36 = vadd.f32 %v3091_v38, %v3011_v33  ;;  %v354_v38 = vadd.f32 %v7283_v8, %v139_v11 }
 0x317   :  { %6841 = vpow2.f32 %v3310_v53  ;;  %v3285_v24 = vrot.slane %v3284_v26, 2  ;;  %v3173_v49 = vpop.f32.mrf.mxu0  ;;  %v984_v45 = vadd.f32 %v7517_v17, %v829_v27 }
 0x318   :  { %v7558_v5 = vpop.eup %6837  ;;  %6843 = vpow2.f32 %v3312_v56  ;;  %v3258_v2 = vadd.f32 %v6576_v15, %v3180_v16  ;;  %v3174_v41 = vadd.f32 %v3173_v49, %v3092_v36  ;;  %v519_v33 = vadd.f32 %v7295_v42, %v354_v38 }
 0x319   :  { %v7561_v61 = vpop.eup %6839  ;;  %v3322_v18 = vsel %vm3261_vm3, %v7558_v5, 0.0  ;;  %v3286_v63 = vmax.f32 %v3284_v26, %v3285_v24 }
 0x31a   :  { %v3323_v0 = vsel %vm3261_vm3, %v7561_v61, 0.0  ;;  %v3252_v22 = vadd.f32 %v3251_v12, %v3174_v41  ;;  %v3290_v46 = vsel %vm3261_vm3, %v3258_v2, -inf  ;;  %v674_v42 = vadd.f32 %v7305_v59, %v519_v33 }
 0x31b   :  { %v3324_v21 = vadd.f32 %v3323_v0, %v3322_v18  ;;  %v3287_v32 = vrot.slane %v3286_v63, 1 }
 0x31c   :  { %v3289_v7 = vsel %vm3261_vm3, %v3252_v22, -inf }
 0x31d   :  { %v3325_v44 = vrot.slane %v3324_v21, 4  ;;  %v3288_v57 = vmax.f32 %v3286_v63, %v3287_v32  ;;  %v3291_v48 = vmax.f32 %v3289_v7, %v3290_v46  ;;  %v144_v32 = vpop.permute.xlu1 %143 }
 0x31f   :  { %v3326_v51 = vadd.f32 %v3325_v44, %v3324_v21  ;;  %v3302_v28 = vsub.f32 %v2757_v40, %v3288_v57  ;;  %v3303_v34 = vsub.f32 %v7548_v31, %v3288_v57  ;;  %v3292_v62 = vrot.slane %v3291_v48, 4 }
 0x320   :  { %v1125_v40 = vadd.f32 %v7511_v58, %v984_v45  ;;  %v837_v58 = vadd.f32 %v7315_v37, %v674_v42  ;;  %v364_v44 = vadd.f32 %v7291_v23, %v144_v32 }
 0x321   :  { %v3327_v13 = vrot.slane %v3326_v51, 2  ;;  %v3314_v3 = vmul.f32 1.442695, %v3302_v28  ;;  %v3316_v9 = vmul.f32 1.442695, %v3303_v34  ;;  %v3293_v47 = vmax.f32 %v3291_v48, %v3292_v62 }
 0x322   :  { %v3371_v24 = vsel %vm3261_vm3, %v1125_v40, 0  ;;  %v990_v59 = vadd.f32 %v7513_v35, %v837_v58  ;;  %v525_v62 = vadd.f32 %v7301_v10, %v364_v44 }
 0x323   :  { %v3328_v1 = vadd.f32 %v3327_v13, %v3326_v51  ;;  %6845 = vpow2.f32 %v3314_v3  ;;  %v3294_v53 = vrot.slane %v3293_v47, 2  ;;  %v7586_v12 = vand.u32 4294901760, %v3371_v24 }
 0x324   :  { %v7574_v56 = vpop.eup %6841  ;;  %6847 = vpow2.f32 %v3316_v9  ;;  %v1131_v35 = vadd.f32 %v7509_v43, %v990_v59  ;;  %v681_v10 = vadd.f32 %v7313_v29, %v525_v62 }
 0x325   :  { %v7576_v8 = vpop.eup %6843  ;;  %v3331_v31 = vsel %vm3261_vm3, %v7574_v56, 0.0  ;;  %v3295_v17 = vmax.f32 %v3293_v47, %v3294_v53  ;;  %v3329_v26 = vrot.slane %v3328_v1, 1  ;;  %v7592_v7 = vsub.f32 %v3371_v24, %v7586_v12 }
 0x326   :  { %v3332_v15 = vsel %vm3261_vm3, %v7576_v8, 0.0  ;;  %v3833_v45 = vsel %vm3261_vm3, %v1131_v35, 0 }
 0x327   :  { %v3333_v14 = vadd.f32 %v3332_v15, %v3331_v31  ;;  %v3296_v16 = vrot.slane %v3295_v17, 1  ;;  %v3330_v36 = vadd.f32 %v3329_v26, %v3328_v1  ;;  %v3442_v51 = vand.u32 4294901760, %v7592_v7 }
 0x328   :  { %v7614_v1 = vand.u32 4294901760, %v3833_v45  ;;  %v7956_v31 = vmov 0.0  }
 0x329   :  { %v3334_v49 = vrot.slane %v3333_v14, 4  ;;  %v3297_v6 = vmax.f32 %v3295_v17, %v3296_v16  ;;  %6849 = vrcp.f32 %v3330_v36  ;;  %v3443_v43 = vsub.f32 %v7592_v7, %v3442_v51 }
 0x32a   :  { %v7629_v16 = vsub.f32 %v3833_v45, %v7614_v1  ;;  %v845_v36 = vadd.f32 %v7323_v54, %v681_v10 }
 0x32b   :  { %v3335_v41 = vadd.f32 %v3334_v49, %v3333_v14  ;;  %v3304_v18 = vsub.f32 %v3252_v22, %v3297_v6  ;;  %v3305_v63 = vsub.f32 %v3258_v2, %v3297_v6  ;;  %v3444_v17 = vand.u32 4294901760, %v3443_v43  ;;  %v149_v49 = vpop.permute.xlu1 %148 }
 0x32c   :  { %v996_v32 = vadd.f32 %v7523_v52, %v845_v36 }
 0x32d   :  { %v3336_v0 = vrot.slane %v3335_v41, 2  ;;  %v3318_v11 = vmul.f32 1.442695, %v3304_v18  ;;  %v3320_v21 = vmul.f32 1.442695, %v3305_v63 }
 0x32e   :  { %v1137_v35 = vadd.f32 %v7519_v39, %v996_v32 }
 0x32f   :  { %v3337_v27 = vadd.f32 %v3336_v0, %v3335_v41  ;;  %6851 = vpow2.f32 %v3318_v11  ;;  %v3904_v11 = vand.u32 4294901760, %v7629_v16 }
 0x330   :  { %v7589_v46 = vpop.eup %6845  ;;  %6853 = vpow2.f32 %v3320_v21  ;;  %v374_v21 = vadd.f32 %v7287_v19, %v149_v49 }
 0x331   :  { %v7594_v37 = vpop.eup %6847  ;;  %v3340_v2 = vsel %vm3261_vm3, %v7589_v46, 0.0  ;;  %v3338_v22 = vrot.slane %v3337_v27, 1 }
 0x332   :  { %v3341_v57 = vsel %vm3261_vm3, %v7594_v37, 0.0 }
 0x333   :  { %v3342_v48 = vadd.f32 %v3341_v57, %v3340_v2  ;;  %v3339_v38 = vadd.f32 %v3338_v22, %v3337_v27  ;;  %v531_v57 = vadd.f32 %v7299_v55, %v374_v21 }
 0x335   :  { %v3343_v28 = vrot.slane %v3342_v48, 4  ;;  %6855 = vrcp.f32 %v3339_v38 }
 0x336   :  { %v6850_v34 = vpop.eup %6849 }
 0x337   :  { %v3344_v13 = vadd.f32 %v3343_v28, %v3342_v48  ;;  %v3360_v3 = vmul.f32 %v6850_v34, %v7561_v61  ;;  %v3359_v23 = vmul.f32 %v6850_v34, %v7558_v5  ;;  %v4295_v28 = vsel %vm3261_vm3, %v1137_v35, 0 }
 0x338   :  { %v688_v34 = vadd.f32 %v7309_v50, %v531_v57 }
 0x339   :  { %v3345_v9 = vrot.slane %v3344_v13, 2  ;;  %v7610_v47 = vand.u32 4294901760, %v3360_v3  ;;  %v7612_v33 = vand.u32 4294901760, %v3359_v23 }
 0x33a   :  { %v853_v43 = vadd.f32 %v7320_v60, %v688_v34 }
 0x33b   :  { %v3346_v53 = vadd.f32 %v3345_v9, %v3344_v13  ;;  %6578 = vmatpush3.msra.mxu0 %v7610_v47  ;;  %v3480_v61 = vsub.f32 %v3360_v3, %v7610_v47  ;;  %v3487_v5 = vsub.f32 %v3359_v23, %v7612_v33  ;;  %v7678_v23 = vand.u32 4294901760, %v4295_v28 }
 0x33c   :  { %v7620_v40 = vpop.eup %6851  ;;  %6579 = vmatprep.subr.mxu0 %v7956_v31 }
 0x33d   :  { %v7623_v26 = vpop.eup %6853  ;;  %v3349_v15 = vsel %vm3261_vm3, %v7620_v40, 0.0  ;;  %6580 = vmatpush3.msra.mxu0 %v7612_v33  ;;  %v3481_v29 = vand.u32 4294901760, %v3480_v61  ;;  %v3488_v42 = vand.u32 4294901760, %v3487_v5  ;;  %v3347_v14 = vrot.slane %v3346_v53, 1 }
 0x33e   :  { %v3350_v24 = vsel %vm3261_vm3, %v7623_v26, 0.0  ;;  %6582 = vmatmul.mubr.f32.vlgmr.msra.gmra.mxu0 %v3444_v17  ;;  %6591 = vmatprep.subr.mxu0 %v7956_v31  ;;  %v7689_v10 = vsub.f32 %v4295_v28, %v7678_v23 }
 0x33f   :  { %v3351_v6 = vadd.f32 %v3350_v24, %v3349_v15  ;;  %6592 = vmatpush3.msra.mxu0 %v3480_v61  ;;  %6595 = vmatprep.mubr.msk.f32.mxu0 %vm6887_vm2, %v7956_v31  ;;  %v3482_v58 = vsub.f32 %v3480_v61, %v3481_v29  ;;  %v3489_v41 = vsub.f32 %v3487_v5, %v3488_v42 }
 0x340   :  { %6593 = vmatprep.subr.mxu0 %v7956_v31  ;;  %v3348_v18 = vadd.f32 %v3347_v14, %v3346_v53  ;;  %v4366_v53 = vand.u32 4294901760, %v7689_v10 }
 0x341   :  { %v3352_v63 = vrot.slane %v3351_v6, 4  ;;  %6594 = vmatpush3.msra.mxu0 %v3487_v5  ;;  %v3483_v54 = vand.u32 4294901760, %v3482_v58  ;;  %v3490_v27 = vand.u32 4294901760, %v3489_v41 }
 0x342   :  { %v6856_v0 = vpop.eup %6855  ;;  %6596 = vmatmul.mubr.f32.vlgmr.msra.gmra.mxu0 %v7592_v7  ;;  %6605 = vmatprep.subr.mxu0 %v7956_v31  ;;  %6857 = vrcp.f32 %v3348_v18  ;;  %v4367_v61 = vsub.f32 %v7689_v10, %v4366_v53 }
 0x343   :  { %v3353_v59 = vadd.f32 %v3352_v63, %v3351_v6  ;;  %6585 = vmatpush3.msra.mxu1 %v3483_v54  ;;  %6606 = vmatpush3.msra.mxu0 %v3481_v29  ;;  %v3363_v2 = vmul.f32 %v6856_v0, %v7576_v8  ;;  %v3362_v22 = vmul.f32 %v6856_v0, %v7574_v56 }
 0x344   :  { %6586 = vmatprep.subr.mxu1 %v7956_v31  ;;  %6607 = vmatprep.subr.mxu0 %v7956_v31  ;;  %v3905_v8 = vsub.f32 %v7629_v16, %v3904_v11  ;;  %v4368_v29 = vand.u32 4294901760, %v4367_v61 }
 0x345   :  { %v3354_v19 = vrot.slane %v3353_v59, 2  ;;  %6587 = vmatpush3.msra.mxu1 %v3490_v27  ;;  %6608 = vmatpush3.msra.mxu0 %v3488_v42  ;;  %v7647_v52 = vand.u32 4294901760, %v3363_v2  ;;  %v7649_v44 = vand.u32 4294901760, %v3362_v22 }
 0x346   :  { %6609 = vmatprep.mubr.msk.f32.mxu0 %vm6887_vm2, %v7956_v31  ;;  %6589 = vmatmul.mubr.f32.vlgmr.msra.gmra.mxu1 %v7586_v12  ;;  %v3906_v62 = vand.u32 4294901760, %v3905_v8 }
 0x347   :  { %v3355_v56 = vadd.f32 %v3354_v19, %v3353_v59  ;;  %6598 = vmatprep.subr.mxu1 %v7956_v31  ;;  %6610 = vmatmul.mubr.f32.vlgmr.msra.gmra.mxu0 %v7586_v12  ;;  %v3942_v48 = vsub.f32 %v3363_v2, %v7647_v52  ;;  %v3949_v55 = vsub.f32 %v3362_v22, %v7649_v44  ;;  %v5218_v22 = vld [vmem:[%s7946_s2] sm:$0xff] }
 0x348   :  { %6619 = vmatprep.subr.mxu0 %v7956_v31  ;;  %6599 = vmatpush3.msra.mxu1 %v7610_v47  ;;  %v5243_v19 = vsel %vm151_vm0, %v5218_v22, 0 }
 0x349   :  { %6620 = vmatpush3.msra.mxu0 %v7647_v52  ;;  %6600 = vmatprep.subr.mxu1 %v7956_v31  ;;  %v3943_v39 = vand.u32 4294901760, %v3942_v48  ;;  %v3356_v38 = vrot.slane %v3355_v56, 1  ;;  %v3950_v13 = vand.u32 4294901760, %v3949_v55 }
 0x34a   :  { %6621 = vmatprep.subr.mxu0 %v7956_v31  ;;  %6601 = vmatpush3.msra.mxu1 %v7612_v33 }
 0x34b   :  { %6602 = vmatprep.mubr.msk.f32.mxu1 %vm6887_vm2, %v7956_v31  ;;  %6622 = vmatpush3.msra.mxu0 %v7649_v44  ;;  %v3944_v45 = vsub.f32 %v3942_v48, %v3943_v39  ;;  %v3357_v3 = vadd.f32 %v3356_v38, %v3355_v56 }
 0x34c   :  { %6623 = vmatprep.mubr.msk.f32.mxu0 %vm6887_vm2, %v7956_v31  ;;  %6603 = vmatmul.mubr.f32.vlgmr.msra.gmra.mxu1 %v3442_v51  ;;  %v3951_v51 = vsub.f32 %v3949_v55, %v3950_v13 }
 0x34d   :  { %6612 = vmatprep.subr.mxu1 %v7956_v31  ;;  %6624 = vmatmul.mubr.f32.vlgmr.msra.gmra.mxu0 %v3906_v62  ;;  %v3945_v7 = vand.u32 4294901760, %v3944_v45  ;;  %6859 = vrcp.f32 %v3357_v3 }
 0x34e   :  { %6633 = vmatprep.subr.mxu0 %v7956_v31  ;;  %6613 = vmatpush3.msra.mxu1 %v7610_v47 }
 0x34f   :  { %v6858_v50 = vpop.eup %6857  ;;  %6634 = vmatpush3.msra.mxu0 %v3942_v48  ;;  %6614 = vmatprep.subr.mxu1 %v7956_v31 }
 0x350   :  { %6635 = vmatprep.subr.mxu0 %v7956_v31  ;;  %6615 = vmatpush3.msra.mxu1 %v7612_v33  ;;  %v3366_v9 = vmul.f32 %v6858_v50, %v7594_v37  ;;  %v3365_v47 = vmul.f32 %v6858_v50, %v7589_v46  ;;  %v1002_v37 = vadd.f32 %v7521_v4, %v853_v43  ;;  %v3952_v33 = vand.u32 4294901760, %v3951_v51 }
 0x351   :  { %6616 = vmatprep.mubr.msk.f32.mxu1 %vm6887_vm2, %v7956_v31  ;;  %6636 = vmatpush3.msra.mxu0 %v3949_v55 }
 0x352   :  { %6637 = vmatprep.mubr.msk.f32.mxu0 %vm6887_vm2, %v7956_v31  ;;  %6617 = vmatmul.mubr.f32.vlgmr.msra.gmra.mxu1 %v7586_v12  ;;  %v7696_v60 = vand.u32 4294901760, %v3366_v9  ;;  %v7706_v12 = vand.u32 4294901760, %v3365_v47  ;;  %v1143_v4 = vadd.f32 %v7515_v30, %v1002_v37 }
 0x353   :  { %6626 = vmatprep.subr.mxu1 %v7956_v31  ;;  %6638 = vmatmul.mubr.f32.vlgmr.msra.gmra.mxu0 %v7629_v16 }
 0x354   :  { %6647 = vmatprep.subr.mxu0 %v7956_v31  ;;  %6627 = vmatpush3.msra.mxu1 %v3945_v7  ;;  %v4404_v46 = vsub.f32 %v3366_v9, %v7696_v60  ;;  %v4411_v5 = vsub.f32 %v3365_v47, %v7706_v12  ;;  %v4757_v17 = vsel %vm3261_vm3, %v1143_v4, 0 }
 0x355   :  { %6648 = vmatpush3.msra.mxu0 %v3943_v39  ;;  %6628 = vmatprep.subr.mxu1 %v7956_v31  ;;  %v7735_v36 = vand.u32 4294901760, %v4757_v17 }
 0x356   :  { %6649 = vmatprep.subr.mxu0 %v7956_v31  ;;  %6629 = vmatpush3.msra.mxu1 %v3952_v33  ;;  %v4405_v30 = vand.u32 4294901760, %v4404_v46  ;;  %v4412_v14 = vand.u32 4294901760, %v4411_v5 }
 0x357   :  { %6630 = vmatprep.mubr.msk.f32.mxu1 %vm6887_vm2, %v7956_v31  ;;  %6650 = vmatpush3.msra.mxu0 %v3950_v13  ;;  %v7745_v6 = vsub.f32 %v4757_v17, %v7735_v36 }
 0x358   :  { %6651 = vmatprep.mubr.msk.f32.mxu0 %vm6887_vm2, %v7956_v31  ;;  %6631 = vmatmul.mubr.f32.vlgmr.msra.gmra.mxu1 %v7614_v1  ;;  %v4406_v42 = vsub.f32 %v4404_v46, %v4405_v30  ;;  %v4413_v49 = vsub.f32 %v4411_v5, %v4412_v14 }
 0x359   :  { %6640 = vmatprep.subr.mxu1 %v7956_v31  ;;  %6652 = vmatmul.mubr.f32.vlgmr.msra.gmra.mxu0 %v7614_v1  ;;  %v4828_v18 = vand.u32 4294901760, %v7745_v6 }
 0x35a   :  { %6661 = vmatprep.subr.mxu0 %v7956_v31  ;;  %6641 = vmatpush3.msra.mxu1 %v7647_v52  ;;  %v6860_v15 = vpop.eup %6859  ;;  %v4407_v16 = vand.u32 4294901760, %v4406_v42  ;;  %v4414_v41 = vand.u32 4294901760, %v4413_v49 }
 0x35b   :  { %6662 = vmatpush3.msra.mxu0 %v7696_v60  ;;  %6642 = vmatprep.subr.mxu1 %v7956_v31  ;;  %v3369_v24 = vmul.f32 %v6860_v15, %v7623_v26  ;;  %v3368_v58 = vmul.f32 %v6860_v15, %v7620_v40  ;;  %v4829_v40 = vsub.f32 %v7745_v6, %v4828_v18 }
 0x35c   :  { %6663 = vmatprep.subr.mxu0 %v7956_v31  ;;  %6643 = vmatpush3.msra.mxu1 %v7649_v44 }
 0x35d   :  { %6644 = vmatprep.mubr.msk.f32.mxu1 %vm6887_vm2, %v7956_v31  ;;  %6664 = vmatpush3.msra.mxu0 %v7706_v12  ;;  %v7752_v26 = vand.u32 4294901760, %v3369_v24 }
 0x35e   :  { %6665 = vmatprep.mubr.msk.f32.mxu0 %vm6887_vm2, %v7956_v31  ;;  %6645 = vmatmul.mubr.f32.vlgmr.msra.gmra.mxu1 %v3904_v11  ;;  %v4830_v11 = vand.u32 4294901760, %v4829_v40 }
 0x35f   :  { %6654 = vmatprep.subr.mxu1 %v7956_v31  ;;  %6666 = vmatmul.mubr.f32.vlgmr.msra.gmra.mxu0 %v4368_v29  ;;  %v4866_v63 = vsub.f32 %v3369_v24, %v7752_v26 }
 0x360   :  { %6675 = vmatprep.subr.mxu0 %v7956_v31  ;;  %6655 = vmatpush3.msra.mxu1 %v7647_v52  ;;  %v7819_v52 = vand.u32 4294901760, %v5243_v19 }
 0x361   :  { %6676 = vmatpush3.msra.mxu0 %v4404_v46  ;;  %6656 = vmatprep.subr.mxu1 %v7956_v31  ;;  %v4867_v0 = vand.u32 4294901760, %v4866_v63 }
 0x362   :  { %6677 = vmatprep.subr.mxu0 %v7956_v31  ;;  %6657 = vmatpush3.msra.mxu1 %v7649_v44  ;;  %v7822_v44 = vsub.f32 %v5243_v19, %v7819_v52 }
 0x363   :  { %6658 = vmatprep.mubr.msk.f32.mxu1 %vm6887_vm2, %v7956_v31  ;;  %6678 = vmatpush3.msra.mxu0 %v4411_v5  ;;  %v4868_v21 = vsub.f32 %v4866_v63, %v4867_v0 }
 0x364   :  { %6679 = vmatprep.mubr.msk.f32.mxu0 %vm6887_vm2, %v7956_v31  ;;  %6659 = vmatmul.mubr.f32.vlgmr.msra.gmra.mxu1 %v7614_v1  ;;  %v4791_v1 = vand.u32 4294901760, %v3368_v58  ;;  %v5325_v57 = vand.u32 4294901760, %v7822_v44 }
 0x365   :  { %6668 = vmatprep.subr.mxu1 %v7956_v31  ;;  %6680 = vmatmul.mubr.f32.vlgmr.msra.gmra.mxu0 %v7689_v10  ;;  %v4869_v59 = vand.u32 4294901760, %v4868_v21 }
 0x366   :  { %6689 = vmatprep.subr.mxu0 %v7956_v31  ;;  %6669 = vmatpush3.msra.mxu1 %v4407_v16  ;;  %v4873_v54 = vsub.f32 %v3368_v58, %v4791_v1 }
 0x367   :  { %6690 = vmatpush3.msra.mxu0 %v4405_v30  ;;  %6670 = vmatprep.subr.mxu1 %v7956_v31 }
 0x368   :  { %6691 = vmatprep.subr.mxu0 %v7956_v31  ;;  %6671 = vmatpush3.msra.mxu1 %v4414_v41  ;;  %v4874_v32 = vand.u32 4294901760, %v4873_v54 }
 0x369   :  { %6672 = vmatprep.mubr.msk.f32.mxu1 %vm6887_vm2, %v7956_v31  ;;  %6692 = vmatpush3.msra.mxu0 %v4412_v14 }
 0x36a   :  { %6693 = vmatprep.mubr.msk.f32.mxu0 %vm6887_vm2, %v7956_v31  ;;  %6673 = vmatmul.mubr.f32.vlgmr.msra.gmra.mxu1 %v7678_v23  ;;  %v4875_v27 = vsub.f32 %v4873_v54, %v4874_v32 }
 0x36b   :  { %6682 = vmatprep.subr.mxu1 %v7956_v31  ;;  %6694 = vmatmul.mubr.f32.vlgmr.msra.gmra.mxu0 %v7678_v23 }
 0x36c   :  { %6703 = vmatprep.subr.mxu0 %v7956_v31  ;;  %6683 = vmatpush3.msra.mxu1 %v7696_v60  ;;  %v4876_v2 = vand.u32 4294901760, %v4875_v27  ;;  %v5220_v27 = vld [vmem:[%s7946_s2 + $0x10] sm:$0xff] }
 0x36d   :  { %6704 = vmatpush3.msra.mxu0 %v7752_v26  ;;  %6684 = vmatprep.subr.mxu1 %v7956_v31 }
 0x36e   :  { %6705 = vmatprep.subr.mxu0 %v7956_v31  ;;  %6685 = vmatpush3.msra.mxu1 %v7706_v12 }
 0x36f   :  { %6686 = vmatprep.mubr.msk.f32.mxu1 %vm6887_vm2, %v7956_v31  ;;  %6706 = vmatpush3.msra.mxu0 %v4791_v1 }
 0x370   :  { %6707 = vmatprep.mubr.msk.f32.mxu0 %vm6887_vm2, %v7956_v31  ;;  %6687 = vmatmul.mubr.f32.vlgmr.msra.gmra.mxu1 %v4366_v53 }
 0x371   :  { %6696 = vmatprep.subr.mxu1 %v7956_v31  ;;  %6708 = vmatmul.mubr.f32.vlgmr.msra.gmra.mxu0 %v4830_v11 }
 0x372   :  { %6717 = vmatprep.subr.mxu0 %v7956_v31  ;;  %6697 = vmatpush3.msra.mxu1 %v7696_v60 }
 0x373   :  { %6718 = vmatpush3.msra.mxu0 %v4866_v63  ;;  %6698 = vmatprep.subr.mxu1 %v7956_v31 }
 0x374   :  { %6719 = vmatprep.subr.mxu0 %v7956_v31  ;;  %6699 = vmatpush3.msra.mxu1 %v7706_v12 }
 0x375   :  { %6700 = vmatprep.mubr.msk.f32.mxu1 %vm6887_vm2, %v7956_v31  ;;  %6720 = vmatpush3.msra.mxu0 %v4873_v54 }
 0x376   :  { %6721 = vmatprep.mubr.msk.f32.mxu0 %vm6887_vm2, %v7956_v31  ;;  %6701 = vmatmul.mubr.f32.vlgmr.msra.gmra.mxu1 %v7678_v23 }
 0x377   :  { %6710 = vmatprep.subr.mxu1 %v7956_v31  ;;  %6722 = vmatmul.mubr.f32.vlgmr.msra.gmra.mxu0 %v7745_v6 }
 0x378   :  { %6731 = vmatprep.subr.mxu0 %v7956_v31  ;;  %6711 = vmatpush3.msra.mxu1 %v4869_v59 }
 0x379   :  { %6732 = vmatpush3.msra.mxu0 %v4867_v0  ;;  %6712 = vmatprep.subr.mxu1 %v7956_v31  ;;  %v5219_v0 = vld [vmem:[%s7946_s2 + $0x8] sm:$0xff] }
 0x37a   :  { %6733 = vmatprep.subr.mxu0 %v7956_v31  ;;  %6713 = vmatpush3.msra.mxu1 %v4876_v2  ;;  %v5246_v59 = vsel %vm151_vm0, %v5219_v0, 0 }
 0x37b   :  { %6714 = vmatprep.mubr.msk.f32.mxu1 %vm6887_vm2, %v7956_v31  ;;  %6734 = vmatpush3.msra.mxu0 %v4874_v32 }
 0x37c   :  { %6735 = vmatprep.mubr.msk.f32.mxu0 %vm6887_vm2, %v7956_v31  ;;  %6715 = vmatmul.mubr.f32.vlgmr.msra.gmra.mxu1 %v7735_v36 }
 0x37d   :  { %6724 = vmatprep.subr.mxu1 %v7956_v31  ;;  %6736 = vmatmul.mubr.f32.vlgmr.msra.gmra.mxu0 %v7735_v36 }
 0x37e   :  { %6725 = vmatpush3.msra.mxu1 %v7752_v26  ;;  %6728 = vmatprep.mubr.msk.f32.mxu1 %vm6887_vm2, %v7956_v31 }
 0x37f   :  { %6726 = vmatprep.subr.mxu1 %v7956_v31 }
 0x380   :  { %6727 = vmatpush3.msra.mxu1 %v4791_v1 }
 0x381   :  { %6729 = vmatmul.mubr.f32.vlgmr.msra.gmra.mxu1 %v4828_v18  ;;  %6738 = vmatprep.subr.mxu1 %v7956_v31 }
 0x382   :  { %6739 = vmatpush3.msra.mxu1 %v7752_v26  ;;  %6742 = vmatprep.mubr.msk.f32.mxu1 %vm6887_vm2, %v7956_v31 }
 0x383   :  { %6740 = vmatprep.subr.mxu1 %v7956_v31  ;;  %v5326_v31 = vsub.f32 %v7822_v44, %v5325_v57 }
 0x384   :  { %6741 = vmatpush3.msra.mxu1 %v4791_v1 }
 0x385   :  { %6743 = vmatmul.mubr.f32.vlgmr.msra.gmra.mxu1 %v7735_v36  ;;  %v5327_v35 = vand.u32 4294901760, %v5326_v31 }
 0x386   :  { %6767 = vmatprep.mubr.f32.mxu1 %v7819_v52 }
 0x387   :  { %6753 = vmatprep.mubr.f32.mxu0 %v5327_v35  ;;  %v5221_v35 = vld [vmem:[%s7946_s2 + $0x18] sm:$0xff]  ;;  %s6888_s2 = smov [#allocation2]  }
 0x388   :  { %s6002_s0 = sshll.u32 %s6888_s2, 4  ;;  %s6003_s0 = int_to_ptr.vmem [resolvable:$true] %s6002_s0 }
 0x389   :  { %s6863_s24 = scalar_lea.vmem %s6003_s0, 256  ;;  %p6868_p1 = scmp.lt.s32.totalorder %s6003_s0, %s6003_s0 }
 0x38a   :  { %p6864_p0 = scmp.ne.s32.totalorder %s6003_s0, %s6863_s24  ;;  %p6869_p2 = scmp.lt.s32.totalorder %s6863_s24, %s6863_s24 }
 0x38c   :  { %p6870_p3 = por %p6869_p2, %p6868_p1 }
 0x38e   :  { %p6871_p4 = pnand %p6870_p3, %p6864_p0 }
 0x3fe   :  { %v3446_v56 = vpop.f32.mrf.mxu0 }
 0x400   :  { %v6583_v8 = vpop.f32.mrf.mxu0 }
 0x402   :  { %v3603_v48 = vpop.f32.mrf.mxu0 }
 0x404   :  { %v6597_v55 = vpop.f32.mrf.mxu0 }
 0x405   :  { %v5249_v55 = vsel %vm151_vm0, %v5220_v27, 0  ;;  %v5225_v27 = vpop.permute.xlu1 %5224 }
 0x406   :  { %v3527_v39 = vpop.f32.mrf.mxu1 }
 0x407   :  { %v3528_v38 = vadd.f32 %v3527_v39, %v3446_v56  ;;  %v3755_v28 = vpop.f32.mrf.mxu0 }
 0x408   :  { %v6590_v34 = vpop.f32.mrf.mxu1 }
 0x409   :  { %v6611_v62 = vpop.f32.mrf.mxu0  ;;  %v3604_v45 = vadd.f32 %v3603_v48, %v3528_v38  ;;  %v7839_v48 = vand.u32 4294901760, %v5246_v59 }
 0x40c   :  { %v3678_v13 = vpop.f32.mrf.mxu1 }
 0x40d   :  { %v3679_v3 = vadd.f32 %v3678_v13, %v3604_v45  ;;  %v3908_v23 = vpop.f32.mrf.mxu0  ;;  %v7843_v45 = vand.u32 4294901760, %v5249_v55 }
 0x40e   :  { %v6604_v50 = vpop.f32.mrf.mxu1 }
 0x40f   :  { %v6625_v43 = vpop.f32.mrf.mxu0  ;;  %v3756_v7 = vadd.f32 %v3755_v28, %v3679_v3  ;;  %v5252_v28 = vsel %vm151_vm0, %v5221_v35, 0  ;;  %v5230_v35 = vpop.permute.xlu1 %5229 }
 0x412   :  { %v3828_v51 = vpop.f32.mrf.mxu1 }
 0x413   :  { %v4065_v9 = vpop.f32.mrf.mxu0  ;;  %v3829_v50 = vadd.f32 %v3828_v51, %v3756_v7 }
 0x414   :  { %v6618_v10 = vpop.f32.mrf.mxu1 }
 0x415   :  { %v6639_v60 = vpop.f32.mrf.mxu0 }
 0x418   :  { %v3989_v47 = vpop.f32.mrf.mxu1 }
 0x419   :  { %v4217_v37 = vpop.f32.mrf.mxu0  ;;  %v3990_v49 = vadd.f32 %v3989_v47, %v3908_v23  ;;  %v7848_v23 = vsub.f32 %v5246_v59, %v7839_v48 }
 0x41a   :  { %v6632_v33 = vpop.f32.mrf.mxu1 }
 0x41b   :  { %v6653_v53 = vpop.f32.mrf.mxu0  ;;  %v4066_v18 = vadd.f32 %v4065_v9, %v3990_v49  ;;  %v7850_v9 = vand.u32 4294901760, %v5252_v28 }
 0x41d   :  { %v7862_v7 = vsub.f32 %v5252_v28, %v7850_v9 }
 0x41e   :  { %v4140_v12 = vpop.f32.mrf.mxu1 }
 0x41f   :  { %v4370_v46 = vpop.f32.mrf.mxu0  ;;  %v4141_v11 = vadd.f32 %v4140_v12, %v4066_v18  ;;  %v5335_v12 = vand.u32 4294901760, %v7848_v23 }
 0x420   :  { %v6646_v4 = vpop.f32.mrf.mxu1 }
 0x421   :  { %v6667_v61 = vpop.f32.mrf.mxu0  ;;  %v4218_v22 = vadd.f32 %v4217_v37, %v4141_v11  ;;  %v7855_v37 = vsub.f32 %v5249_v55, %v7843_v45 }
 0x424   :  { %v4290_v5 = vpop.f32.mrf.mxu1 }
 0x425   :  { %v4527_v30 = vpop.f32.mrf.mxu0  ;;  %v4291_v34 = vadd.f32 %v4290_v5, %v4218_v22  ;;  %v5345_v5 = vand.u32 4294901760, %v7855_v37 }
 0x426   :  { %v6660_v17 = vpop.f32.mrf.mxu1 }
 0x427   :  { %v6681_v15 = vpop.f32.mrf.mxu0  ;;  %v7852_v60 = vand.u32 4294901760, %v4291_v34  ;;  %v5336_v17 = vsub.f32 %v7848_v23, %v5335_v12 }
 0x429   :  { %v5403_v61 = vsub.f32 %v4291_v34, %v7852_v60 }
 0x42a   :  { %v4451_v29 = vpop.f32.mrf.mxu1 }
 0x42b   :  { %v4679_v42 = vpop.f32.mrf.mxu0  ;;  %v4452_v24 = vadd.f32 %v4451_v29, %v4370_v46  ;;  %v7859_v46 = vand.u32 4294901760, %v3829_v50 }
 0x42c   :  { %v6674_v14 = vpop.f32.mrf.mxu1 }
 0x42d   :  { %v6695_v36 = vpop.f32.mrf.mxu0  ;;  %v4528_v26 = vadd.f32 %v4527_v30, %v4452_v24  ;;  %v5410_v29 = vsub.f32 %v3829_v50, %v7859_v46  ;;  %v5404_v24 = vand.u32 4294901760, %v5403_v61 }
 0x42e   :  { %v5346_v36 = vsub.f32 %v7855_v37, %v5345_v5 }
 0x430   :  { %v4602_v16 = vpop.f32.mrf.mxu1  ;;  %v5347_v18 = vand.u32 4294901760, %v5346_v36 }
 0x431   :  { %v4832_v6 = vpop.f32.mrf.mxu0  ;;  %v4603_v1 = vadd.f32 %v4602_v16, %v4528_v26  ;;  %v5337_v16 = vand.u32 4294901760, %v5336_v17 }
 0x432   :  { %v6688_v58 = vpop.f32.mrf.mxu1 }
 0x433   :  { %v6709_v41 = vpop.f32.mrf.mxu0  ;;  %v4680_v32 = vadd.f32 %v4679_v42, %v4603_v1  ;;  %v5355_v42 = vand.u32 4294901760, %v7862_v7  ;;  %v5411_v58 = vand.u32 4294901760, %v5410_v29  ;;  %v5405_v1 = vsub.f32 %v5403_v61, %v5404_v24 }
 0x435   :  { %v5356_v26 = vsub.f32 %v7862_v7, %v5355_v42  ;;  %v5406_v0 = vand.u32 4294901760, %v5405_v1  ;;  %v7957_v1 = vld [vmem:[#allocation6_spill] sm:$0xff] }
 0x436   :  { %v4752_v63 = vpop.f32.mrf.mxu1 }
 0x437   :  { %v4989_v40 = vpop.f32.mrf.mxu0  ;;  %v4753_v56 = vadd.f32 %v4752_v63, %v4680_v32 }
 0x438   :  { %v6702_v54 = vpop.f32.mrf.mxu1 }
 0x439   :  { %v6723_v21 = vpop.f32.mrf.mxu0  ;;  %v7845_v13 = vand.u32 4294901760, %v4753_v56  ;;  %v5412_v54 = vsub.f32 %v5410_v29, %v5411_v58 }
 0x43b   :  { %v5396_v33 = vsub.f32 %v4753_v56, %v7845_v13  ;;  %v5413_v11 = vand.u32 4294901760, %v5412_v54 }
 0x43c   :  { %v4913_v2 = vpop.f32.mrf.mxu1 }
 0x43d   :  { %v4914_v19 = vadd.f32 %v4913_v2, %v4832_v6  ;;  %v5141_v31 = vpop.f32.mrf.mxu0  ;;  %v5397_v15 = vand.u32 4294901760, %v5396_v33 }
 0x43e   :  { %v6716_v8 = vpop.f32.mrf.mxu1 }
 0x43f   :  { %v6737_v39 = vpop.f32.mrf.mxu0  ;;  %v4990_v38 = vadd.f32 %v4989_v40, %v4914_v19  ;;  %v5398_v6 = vsub.f32 %v5396_v33, %v5397_v15  ;;  %v5357_v40 = vand.u32 4294901760, %v5356_v26 }
 0x440   :  { %v5240_v39 = vpop.permute.xlu0 %5239 }
 0x441   :  { %v5064_v62 = vpop.f32.mrf.mxu1  ;;  %v5399_v63 = vand.u32 4294901760, %v5398_v6 }
 0x442   :  { %v5065_v3 = vadd.f32 %v5064_v62, %v4990_v38 }
 0x443   :  { %v6730_v43 = vpop.f32.mrf.mxu1 }
 0x444   :  { %v5142_v10 = vadd.f32 %v5141_v31, %v5065_v3 }
 0x445   :  { %v5214_v47 = vpop.f32.mrf.mxu1 }
 0x446   :  { %v5215_v53 = vadd.f32 %v5214_v47, %v5142_v10 }
 0x447   :  { %v6744_v4 = vpop.f32.mrf.mxu1 }
 0x448   :  { %v7864_v51 = vand.u32 4294901760, %v5215_v53 }
 0x44a   :  { %v5389_v30 = vsub.f32 %v5215_v53, %v7864_v51  ;;  %6745 = vmatprep.subr.mxu0 %v7864_v51 }
 0x44b   :  { %6746 = vmatpush3.msra.mxu0 %v7864_v51 }
 0x44c   :  { %6747 = vmatprep.subr.mxu0 %v7845_v13  ;;  %v5390_v14 = vand.u32 4294901760, %v5389_v30 }
 0x44d   :  { %6748 = vmatpush3.msra.mxu0 %v7845_v13 }
 0x44e   :  { %6749 = vmatprep.subr.mxu0 %v7852_v60  ;;  %v5391_v49 = vsub.f32 %v5389_v30, %v5390_v14 }
 0x44f   :  { %6750 = vmatpush3.msra.mxu0 %v7852_v60 }
 0x450   :  { %6751 = vmatprep.subr.mxu0 %v7859_v46  ;;  %v5392_v41 = vand.u32 4294901760, %v5391_v49 }
 0x451   :  { %6752 = vmatpush3.msra.mxu0 %v7859_v46 }
 0x452   :  { %6754 = vmatmul.mubr.f32.vlgmr.msra.gmra.mxu0 %v5337_v16  ;;  %6759 = vmatprep.subr.mxu1 %v5392_v41 }
 0x453   :  { %6773 = vmatprep.subr.mxu0 %v5389_v30  ;;  %6760 = vmatpush3.msra.mxu1 %v5392_v41 }
 0x454   :  { %6774 = vmatpush3.msra.mxu0 %v5389_v30  ;;  %6761 = vmatprep.subr.mxu1 %v5399_v63 }
 0x455   :  { %6775 = vmatprep.subr.mxu0 %v5396_v33  ;;  %6756 = vmatprep.mubr.f32.mxu0 %v5347_v18 }
 0x456   :  { %6762 = vmatpush3.msra.mxu1 %v5399_v63  ;;  %6776 = vmatpush3.msra.mxu0 %v5396_v33 }
 0x457   :  { %6757 = vmatmul.mubr.f32.gmra.mxu0 %v5357_v40  ;;  %6763 = vmatprep.subr.mxu1 %v5406_v0  ;;  %v7958_v40 = vld [vmem:[#allocation5_spill] sm:$0xff] }
 0x458   :  { %6777 = vmatprep.subr.mxu0 %v5403_v61  ;;  %6764 = vmatpush3.msra.mxu1 %v5406_v0 }
 0x459   :  { %6778 = vmatpush3.msra.mxu0 %v5403_v61  ;;  %6765 = vmatprep.subr.mxu1 %v5413_v11 }
 0x45a   :  { %6779 = vmatprep.subr.mxu0 %v5410_v29  ;;  %6766 = vmatpush3.msra.mxu1 %v5413_v11 }
 0x45b   :  { %6780 = vmatpush3.msra.mxu0 %v5410_v29  ;;  %6768 = vmatmul.mubr.f32.vlgmr.msra.gmra.mxu1 %v7839_v48 }
 0x45c   :  { %6781 = vmatprep.mubr.f32.mxu0 %v7822_v44  ;;  %6787 = vmatprep.subr.mxu1 %v7864_v51 }
 0x45d   :  { %6801 = vmatprep.subr.mxu0 %v5390_v14  ;;  %6782 = vmatmul.mubr.f32.vlgmr.msra.gmra.mxu0 %v7848_v23 }
 0x45e   :  { %6788 = vmatpush3.msra.mxu1 %v7864_v51  ;;  %6802 = vmatpush3.msra.mxu0 %v5390_v14 }
 0x45f   :  { %6789 = vmatprep.subr.mxu1 %v7845_v13  ;;  %6803 = vmatprep.subr.mxu0 %v5397_v15 }
 0x460   :  { %6770 = vmatprep.mubr.f32.mxu1 %v7843_v45  ;;  %6790 = vmatpush3.msra.mxu1 %v7845_v13 }
 0x461   :  { %6804 = vmatpush3.msra.mxu0 %v5397_v15  ;;  %6771 = vmatmul.mubr.f32.gmra.mxu1 %v7850_v9 }
 0x462   :  { %6791 = vmatprep.subr.mxu1 %v7852_v60  ;;  %6805 = vmatprep.subr.mxu0 %v5404_v24 }
 0x463   :  { %6784 = vmatprep.mubr.f32.mxu0 %v7855_v37  ;;  %6792 = vmatpush3.msra.mxu1 %v7852_v60 }
 0x464   :  { %6806 = vmatpush3.msra.mxu0 %v5404_v24  ;;  %6793 = vmatprep.subr.mxu1 %v7859_v46 }
 0x465   :  { %6785 = vmatmul.mubr.f32.gmra.mxu0 %v7862_v7  ;;  %6807 = vmatprep.subr.mxu0 %v5411_v58 }
 0x466   :  { %6794 = vmatpush3.msra.mxu1 %v7859_v46  ;;  %6795 = vmatprep.mubr.f32.mxu1 %v5325_v57 }
 0x467   :  { %6808 = vmatpush3.msra.mxu0 %v5411_v58  ;;  %6796 = vmatmul.mubr.f32.vlgmr.msra.gmra.mxu1 %v5335_v12 }
 0x468   :  { %6815 = vmatprep.subr.mxu1 %v7864_v51  ;;  %6809 = vmatprep.mubr.f32.mxu0 %v7819_v52 }
 0x469   :  { %6816 = vmatpush3.msra.mxu1 %v7864_v51  ;;  %6810 = vmatmul.mubr.f32.vlgmr.msra.gmra.mxu0 %v7839_v48 }
 0x46a   :  { %6817 = vmatprep.subr.mxu1 %v7845_v13  ;;  %6798 = vmatprep.mubr.f32.mxu1 %v5345_v5 }
 0x46b   :  { %6818 = vmatpush3.msra.mxu1 %v7845_v13  ;;  %6812 = vmatprep.mubr.f32.mxu0 %v7843_v45 }
 0x46c   :  { %6799 = vmatmul.mubr.f32.gmra.mxu1 %v5355_v42  ;;  %6819 = vmatprep.subr.mxu1 %v7852_v60 }
 0x46d   :  { %6820 = vmatpush3.msra.mxu1 %v7852_v60  ;;  %6813 = vmatmul.mubr.f32.gmra.mxu0 %v7850_v9 }
 0x46e   :  { %6821 = vmatprep.subr.mxu1 %v7859_v46  ;;  %6823 = vmatprep.mubr.f32.mxu1 %v7819_v52 }
 0x46f   :  { %6822 = vmatpush3.msra.mxu1 %v7859_v46 }
 0x470   :  { %6824 = vmatmul.mubr.f32.vlgmr.msra.gmra.mxu1 %v7839_v48 }
 0x471   :  { %6826 = vmatprep.mubr.f32.mxu1 %v7843_v45  ;;  %v5235_v45 = vpop.permute.xlu1 %5234 }
 0x474   :  { %6827 = vmatmul.mubr.f32.gmra.mxu1 %v7850_v9 }
 0x512   :  { %v6755_v44 = vpop.f32.mrf.mxu0 }
 0x513   :  { %v5340_v52 = vadd.f32 %v6755_v44, %v5230_v35 }
 0x514   :  { %v5329_v57 = vpop.f32.mrf.mxu0 }
 0x515   :  { %v5330_v8 = vadd.f32 %v5329_v57, %v5225_v27 }
 0x517   :  { %v6758_v21 = vpop.f32.mrf.mxu0 }
 0x518   :  { %v5360_v38 = vadd.f32 %v6758_v21, %v5240_v39 }
 0x519   :  { %v5349_v32 = vpop.f32.mrf.mxu0 }
 0x51a   :  { %v5350_v13 = vadd.f32 %v5349_v32, %v5235_v45 }
 0x51b   :  { %v6769_v59 = vpop.f32.mrf.mxu1 }
 0x51c   :  { %v5457_v55 = vadd.f32 %v6769_v59, %v5340_v52 }
 0x51d   :  { %v5450_v2 = vpop.f32.mrf.mxu1  ;;  %v6783_v22 = vpop.f32.mrf.mxu0 }
 0x51e   :  { %v5451_v28 = vadd.f32 %v5450_v2, %v5330_v8  ;;  %v5556_v3 = vadd.f32 %v6783_v22, %v5457_v55 }
 0x51f   :  { %v5548_v31 = vpop.f32.mrf.mxu0 }
 0x520   :  { %v5549_v9 = vadd.f32 %v5548_v31, %v5451_v28 }
 0x521   :  { %v6772_v19 = vpop.f32.mrf.mxu1 }
 0x522   :  { %v5469_v23 = vadd.f32 %v6772_v19, %v5360_v38 }
 0x523   :  { %v5462_v56 = vpop.f32.mrf.mxu1 }
 0x524   :  { %v5463_v10 = vadd.f32 %v5462_v56, %v5350_v13 }
 0x525   :  { %v6786_v48 = vpop.f32.mrf.mxu0 }
 0x526   :  { %v5570_v33 = vadd.f32 %v6786_v48, %v5469_v23 }
 0x527   :  { %v5562_v34 = vpop.f32.mrf.mxu0  ;;  %v6797_v62 = vpop.f32.mrf.mxu1 }
 0x528   :  { %v5655_v60 = vadd.f32 %v6797_v62, %v5556_v3  ;;  %v5563_v4 = vadd.f32 %v5562_v34, %v5463_v10 }
 0x529   :  { %v5646_v50 = vpop.f32.mrf.mxu1  ;;  %v6811_v43 = vpop.f32.mrf.mxu0 }
 0x52a   :  { %v5647_v53 = vadd.f32 %v5646_v50, %v5549_v9  ;;  %v5760_v7 = vadd.f32 %v6811_v43, %v5655_v60 }
 0x52b   :  { %v5753_v47 = vpop.f32.mrf.mxu0 }
 0x52c   :  { %v6800_v37 = vpop.f32.mrf.mxu1  ;;  %v5754_v5 = vadd.f32 %v5753_v47, %v5647_v53 }
 0x52d   :  { %v6814_v46 = vpop.f32.mrf.mxu0  ;;  %v5671_v51 = vadd.f32 %v6800_v37, %v5570_v33  ;;  %v5918_v37 = vpop.permute.xlu1 %5917 }
 0x52e   :  { %v5662_v12 = vpop.f32.mrf.mxu1  ;;  %v5923_v33 = vpop.permute.xlu0 %5922 }
 0x52f   :  { %v5663_v30 = vadd.f32 %v5662_v12, %v5563_v4  ;;  %v5765_v15 = vpop.f32.mrf.mxu0  ;;  %v5772_v42 = vadd.f32 %v6814_v46, %v5671_v51 }
 0x530   :  { %v6825_v61 = vpop.f32.mrf.mxu1 }
 0x531   :  { %v5853_v17 = vadd.f32 %v6825_v61, %v5760_v7  ;;  %v5766_v24 = vadd.f32 %v5765_v15, %v5663_v30  ;;  %v5942_v12 = vpop.permute.xlu1 %5941 }
 0x532   :  { %v5846_v29 = vpop.f32.mrf.mxu1  ;;  %v5928_v51 = vpop.permute.xlu0 %5927 }
 0x533   :  { %v5847_v14 = vadd.f32 %v5846_v29, %v5754_v5  ;;  %v5869_v16 = vadd.f32 %v5853_v17, %v6980_v25 }
 0x534   :  { %v6828_v36 = vpop.f32.mrf.mxu1 }
 0x535   :  { %v5868_v49 = vadd.f32 %v5847_v14, %v6969_v20  ;;  %v5865_v6 = vadd.f32 %v6828_v36, %v5772_v42  ;;  %v5873_v18 = vsel %vm3261_vm3, %v5869_v16, 0.0  ;;  %v5947_v17 = vpop.permute.xlu1 %5946 }
 0x536   :  { %v5858_v26 = vpop.f32.mrf.mxu1  ;;  %v5933_v14 = vpop.permute.xlu0 %5932 }
 0x537   :  { %v5872_v58 = vsel %vm3261_vm3, %v5868_v49, 0.0  ;;  %v5859_v41 = vadd.f32 %v5858_v26, %v5766_v24  ;;  %v5871_v63 = vadd.f32 %v5865_v6, %v7957_v1 }
 0x538   :  { %v5874_v0 = vadd.f32 %v5873_v18, %v5872_v58 }
 0x539   :  { %v5870_v54 = vadd.f32 %v5859_v41, %v7958_v40  ;;  %v5877_v57 = vsel %vm3261_vm3, %v5871_v63, 0.0  ;;  %v5952_v36 = vpop.permute.xlu1 %5951 }
 0x53b   :  { %v5875_v11 = vsel %vm3261_vm3, %v5870_v54, 0.0 }
 0x53c   :  { %v5876_v44 = vadd.f32 %v5875_v11, %v5874_v0 }
 0x53e   :  { %v5878_v25 = vadd.f32 %v5877_v57, %v5876_v44 }
 0x540   :  { %v5879_v21 = vrot.slane %v5878_v25, 4 }
 0x542   :  { %v5880_v20 = vadd.f32 %v5879_v21, %v5878_v25 }
 0x544   :  { %v5881_v32 = vrot.slane %v5880_v20, 2 }
 0x546   :  { %v5882_v59 = vadd.f32 %v5881_v32, %v5880_v20 }
 0x548   :  { %v5883_v27 = vrot.slane %v5882_v59, 1 }
 0x54a   :  { %v5884_v2 = vadd.f32 %v5883_v27, %v5882_v59 }
 0x54c   :  { %v5886_v22 = vmul.f32 0.03125, %v5884_v2 }
 0x54e   :  { %v5887_v19 = vsub.f32 %v5868_v49, %v5886_v22  ;;  %v5888_v31 = vsub.f32 %v5869_v16, %v5886_v22  ;;  %v5889_v35 = vsub.f32 %v5870_v54, %v5886_v22  ;;  %v5890_v52 = vsub.f32 %v5871_v63, %v5886_v22  ;;  %v5957_v49 = vpop.permute.xlu0 %5956 }
 0x550   :  { %v5891_v56 = vmul.f32 %v5887_v19, %v5887_v19  ;;  %v5892_v8 = vmul.f32 %v5888_v31, %v5888_v31  ;;  %v5893_v55 = vmul.f32 %v5889_v35, %v5889_v35  ;;  %v5894_v48 = vmul.f32 %v5890_v52, %v5890_v52 }
 0x552   :  { %v5895_v39 = vsel %vm3261_vm3, %v5891_v56, 0.0  ;;  %v5896_v38 = vsel %vm3261_vm3, %v5892_v8, 0.0  ;;  %v5898_v34 = vsel %vm3261_vm3, %v5893_v55, 0.0  ;;  %v5900_v45 = vsel %vm3261_vm3, %v5894_v48, 0.0 }
 0x553   :  { %v5897_v28 = vadd.f32 %v5896_v38, %v5895_v39 }
 0x555   :  { %v5899_v62 = vadd.f32 %v5898_v34, %v5897_v28 }
 0x557   :  { %v5901_v13 = vadd.f32 %v5900_v45, %v5899_v62 }
 0x559   :  { %v5902_v3 = vrot.slane %v5901_v13, 4 }
 0x55b   :  { %v5903_v23 = vadd.f32 %v5902_v3, %v5901_v13 }
 0x55d   :  { %v5904_v50 = vrot.slane %v5903_v23, 2 }
 0x55f   :  { %v5905_v43 = vadd.f32 %v5904_v50, %v5903_v23 }
 0x561   :  { %v5906_v9 = vrot.slane %v5905_v43, 1 }
 0x563   :  { %v5907_v10 = vadd.f32 %v5906_v9, %v5905_v43 }
 0x565   :  { %v5908_v60 = vmul.f32 0.03125, %v5907_v10 }
 0x567   :  { %v5909_v47 = vadd.f32 1e-05, %v5908_v60 }
 0x569   :  { %6861 = vrsqrt.f32 %v5909_v47 }
 0x576   :  { %v6862_v53 = vpop.eup %6861 }
 0x577   :  { %v5911_v46 = vmul.f32 %v6862_v53, %v5887_v19  ;;  %v5912_v4 = vmul.f32 %v6862_v53, %v5888_v31  ;;  %v5913_v61 = vmul.f32 %v6862_v53, %v5889_v35  ;;  %v5914_v42 = vmul.f32 %v6862_v53, %v5890_v52 }
 0x579   :  { %v5935_v7 = vmul.f32 %v5918_v37, %v5911_v46  ;;  %v5936_v30 = vmul.f32 %v5923_v33, %v5912_v4  ;;  %v5937_v15 = vmul.f32 %v5928_v51, %v5913_v61  ;;  %v5938_v16 = vmul.f32 %v5933_v14, %v5914_v42 }
 0x57b   :  { %v5959_v5 = vadd.f32 %v5942_v12, %v5935_v7  ;;  %v5960_v29 = vadd.f32 %v5947_v17, %v5936_v30  ;;  %v5961_v24 = vadd.f32 %v5952_v36, %v5937_v15  ;;  %v5962_v6 = vadd.f32 %v5957_v49, %v5938_v16 }
 0x57d   :  { %5963 = vxpose.xlu1.b32.start [1/4] (short) (narrow) %v5959_v5, 16 }
 0x581   :  { %5964 = vxpose.xlu1.b32.cont [2/4] (short) (narrow) %v5960_v29, 16 }
 0x585   :  { %5965 = vxpose.xlu1.b32.cont [3/4] (short) (narrow) %v5961_v24, 16 }
 0x589   :  { %5966 = vxpose.xlu1.b32.end [4/4] (short) (narrow) %v5962_v6, 16 }
 0x5f9   :  { %v5979_v26 = vpop.trf.xlu1 }
 0x5fa   :  { %5995 = vst.msk [vmem:[#allocation2] sm:$0xff] %vm151_vm0, %v5979_v26 }
 0x5fd   :  { %v5980_v58 = vpop.trf.xlu1 }
 0x5fe   :  { %5996 = vst.msk [vmem:[#allocation2 + $0x8] sm:$0xff] %vm151_vm0, %v5980_v58 }
 0x5ff   :  { %6874 = shalt.err (!%p6871_p4)
}
 0x600   :  { %s6889_s25 = smov 128   ;;  %s6890_s26 = smov 8  }
 0x601   :  { %6008 = dma.vmem_to_hbm [thread:$0]  %s6003_s0, 256, %s7949_s5, [#allocation3], %s6889_s25, %s6889_s25, %s6890_s26  }
 0x602   :  { %6883 = dma.done.wait [#allocation3], 256  }
 0x603   :  { %6884 = vsyncadd [#allocation3], 4294967040 }
 0x604   :  { %6012 = vsyncpa [#allocation3], 1 }

</bundles_post_ra>
